<compile_context>
chip_gen: v7x
topology: tpu7x:2x2x1
jax: 0.10.0
libtpu: 0.0.40
codegen_flags: <defaults>
</compile_context>

<pallas_src>
import functools

import numpy as np
import jax
import jax.numpy as jnp
from jax.experimental import pallas as pl
from jax.experimental.pallas import tpu as pltpu


def _gaussian_taps_1d(kernel_size: int, sigma: float):
    """1D taps g with outer(g, g) == the reference's normalized 2D Gaussian kernel."""
    ax = np.arange(kernel_size, dtype=np.float64) - (kernel_size - 1) / 2.0
    g = np.exp(-(ax ** 2) / (2.0 * sigma ** 2))
    return g / g.sum()


def _reflect_index(t: int, n: int) -> int:
    # PyTorch 'reflect' padding (no edge duplication); requires pad < n.
    if t < 0:
        return -t
    if t > n - 1:
        return 2 * (n - 1) - t
    return t


def _gaussian_band_matrix(n: int, taps) -> np.ndarray:
    """(n, n) matrix G so that G @ v == valid-conv(reflect_pad(v), taps) along that axis."""
    K = len(taps)
    pad = K // 2
    G = np.zeros((n, n), dtype=np.float64)
    for i in range(n):
        for a in range(K):
            G[i, _reflect_index(i + a - pad, n)] += taps[a]
    return G.astype(np.float32)


def _vmem_capacity_bytes() -> int:
    try:
        info = pltpu.get_tpu_info()
        for name in ("vmem_capacity_bytes", "vmem_size_bytes", "vmem_bytes"):
            v = getattr(info, name, None)
            if v:
                return int(v)
    except Exception:
        pass
    return 64 << 20  # conservative fallback: v7x physical VMEM per TensorCore


# ----------------------------------------------------------------------------
# Fused Pallas kernel (per batch element): mask -> MXU band-matmul Gaussian blurs ->
# SSIM formula -> per-batch weighted SSIM/L1 loss.
# ----------------------------------------------------------------------------
def _fused_photometric_kernel(rs_ref, src_ref, mask_ref, gv_ref, ght_ref, out_ref, *,
                              C, H, W, c1, c2, eps, l1_weight, ssim_weight):
    mask = mask_ref[0]          # (H, W)  combined flow-validity & user mask (0/1 float)
    gv = gv_ref[...]            # (H, H)  vertical Gaussian band matrix (reflection folded in)
    ght = ght_ref[...]          # (W, W)  horizontal Gaussian band matrix, already transposed

    def blur(a):                # (H, W) -> (H, W): two MXU matmuls replace the 121-tap conv
        t = jnp.dot(gv, a, preferred_element_type=jnp.float32)       # vertical pass
        return jnp.dot(t, ght, preferred_element_type=jnp.float32)   # horizontal pass

    l1_sum = jnp.float32(0.0)
    ssim_sum = jnp.float32(0.0)
    for c in range(C):          # static unroll; temporaries stay at (H, W) granularity
        xc = rs_ref[c] * mask   # masked resampled source, channel c
        yc = src_ref[c] * mask  # masked source, channel c
        l1_sum = l1_sum + jnp.sum(jnp.abs(xc - yc))

        mu1 = blur(xc)
        mu2 = blur(yc)
        s11 = blur(xc * xc)
        s22 = blur(yc * yc)
        s12 = blur(xc * yc)

        mu1_sq = mu1 * mu1
        mu2_sq = mu2 * mu2
        mu1_mu2 = mu1 * mu2
        sigma1_sq = s11 - mu1_sq
        sigma2_sq = s22 - mu2_sq
        sigma12 = s12 - mu1_mu2
        numerator = (2.0 * mu1_mu2 + c1) * (2.0 * sigma12 + c2)
        denominator = (mu1_sq + mu2_sq + c1) * (sigma1_sq + sigma2_sq + c2)
        ssim_sum = ssim_sum + jnp.sum(numerator / (denominator + eps))

    inv_n = 1.0 / float(C * H * W)          # torch .mean() over C*H*W (masked pixels included)
    l1_loss = l1_sum * inv_n
    ssim_loss = 1.0 - ssim_sum * inv_n
    loss_b = l1_weight * l1_loss + ssim_weight * ssim_loss

    # Single lane-dense tiny output block per batch element.
    out_ref[...] = jnp.broadcast_to(loss_b, (1, 128)).astype(jnp.float32)


# ----------------------------------------------------------------------------
# Wrapper equivalent to FlowPhotoMetricLoss.forward
# ----------------------------------------------------------------------------
def flow_photometric_loss(source, reference, flow_pred, valid_mask=None, *,
                          ssim_weight=0.85, ssim_window_size=11, ssim_max_val=1.0,
                          ssim_sigma=1.5, ssim_eps=1e-12,
                          max_displacement_ratio=0.15):
    B, C, H, W = source.shape
    assert flow_pred.shape == (B, 2, H, W)
    pad = ssim_window_size // 2
    assert H > pad and W > pad, "reflect padding requires H, W > kernel_size // 2"

    src = source.astype(jnp.float32)
    ref = reference.astype(jnp.float32)
    flow = flow_pred.astype(jnp.float32)

    # ---- combined validity mask (strict '<' with no abs(), exactly as in the reference) ----
    max_dx = int(max_displacement_ratio * W)   # flow channel 0 checked against W
    max_dy = int(max_displacement_ratio * H)   # flow channel 1 checked against H
    fmask = (flow[:, 0] < float(max_dx)) & (flow[:, 1] < float(max_dy))      # (B, H, W)
    if valid_mask is not None:
        fmask = fmask & (valid_mask.reshape(B, H, W) != 0)
    mask = fmask[:, None, :, :].astype(jnp.float32)                          # (B, 1, H, W)

    # ---- bilinear grid_sample(reference, grid - flow, align_corners=True, zeros padding) ----
    # TODO(synk): the data-dependent 2-D gather stays an O(HW) XLA gather in the wrapper; there
    # is no robust general-size in-kernel Pallas-TPU vector gather.
    gx = jnp.arange(W, dtype=jnp.float32)[None, None, :]
    gy = jnp.arange(H, dtype=jnp.float32)[None, :, None]
    sx = gx - flow[:, 0]                 # (B, H, W) absolute x sample coords
    sy = gy - flow[:, 1]                 # (B, H, W) absolute y sample coords
    x0 = jnp.floor(sx); x1 = x0 + 1.0
    y0 = jnp.floor(sy); y1 = y0 + 1.0
    wx1 = sx - x0; wx0 = 1.0 - wx1
    wy1 = sy - y0; wy0 = 1.0 - wy1
    ref_flat = ref.reshape(B, C, H * W)

    def corner(cx, cy, w):
        valid = (cx >= 0.0) & (cx <= float(W - 1)) & (cy >= 0.0) & (cy <= float(H - 1))
        xi = jnp.clip(cx, 0.0, float(W - 1)).astype(jnp.int32)
        yi = jnp.clip(cy, 0.0, float(H - 1)).astype(jnp.int32)
        q = (yi * W + xi).reshape(B, 1, H * W)
        g = jnp.take_along_axis(ref_flat, jnp.broadcast_to(q, (B, C, H * W)), axis=2)
        return g * (w * valid.astype(jnp.float32)).reshape(B, 1, H * W)

    rs = (corner(x0, y0, wx0 * wy0) + corner(x1, y0, wx1 * wy0)
          + corner(x0, y1, wx0 * wy1) + corner(x1, y1, wx1 * wy1)).reshape(B, C, H, W)

    # ---- Gaussian band matrices with the reflect boundary folded into the weights ----
    taps = _gaussian_taps_1d(ssim_window_size, ssim_sigma)
    gv = jnp.asarray(_gaussian_band_matrix(H, taps))          # (H, H)
    ght = jnp.asarray(_gaussian_band_matrix(W, taps).T)       # (W, W), pre-transposed
    c1 = (0.01 * ssim_max_val) ** 2
    c2 = (0.03 * ssim_max_val) ** 2

    kern = functools.partial(_fused_photometric_kernel, C=C, H=H, W=W, c1=c1, c2=c2,
                             eps=ssim_eps, l1_weight=1.0 - ssim_weight,
                             ssim_weight=ssim_weight)

    # ---- generation-aware VMEM budget (never clamp below the actual requirement) ----
    in_block_bytes = 4 * (2 * C + 1) * H * W                   # rs + src + mask, per batch elem
    const_bytes = 4 * (H * H + W * W)                          # Gv + Gh^T
    tmp_bytes = 4 * 16 * H * W                                 # per-channel (H, W) working set
    need = 2 * in_block_bytes + 2 * const_bytes + tmp_bytes + (64 << 10)
    vmem_cap = int(0.75 * _vmem_capacity_bytes())              # ~48 MiB on v7x, ~96 MiB on v5e/v6e
    vmem_limit = max(min(max(need, 32 << 20), vmem_cap), need)
    # TODO(synk): if `need` ever exceeds ~75% of physical VMEM (very large H*W), add a
    # row-strip grid axis with halo and pl.when-finalized partial-sum accumulators.

    flops = B * (5 * C * 2 * H * W * (H + W) + 40 * C * H * W)
    bytes_accessed = B * (2 * C + 1) * H * W * 4 + (H * H + W * W) * 4 + B * 128 * 4

    loss_b = pl.pallas_call(
        kern,
        out_shape=jax.ShapeDtypeStruct((B, 1, 128), jnp.float32),
        grid=(B,),
        in_specs=[pl.BlockSpec((None, C, H, W), lambda b: (b, 0, 0, 0)),
                  pl.BlockSpec((None, C, H, W), lambda b: (b, 0, 0, 0)),
                  pl.BlockSpec((None, 1, H, W), lambda b: (b, 0, 0, 0)),
                  pl.BlockSpec((H, H), lambda b: (0, 0)),
                  pl.BlockSpec((W, W), lambda b: (0, 0))],
        out_specs=pl.BlockSpec((None, 1, 128), lambda b: (b, 0, 0)),
        compiler_params=pltpu.CompilerParams(
            dimension_semantics=("parallel",),
            vmem_limit_bytes=int(vmem_limit)),
        cost_estimate=pl.CostEstimate(flops=int(flops), transcendentals=0,
                                      bytes_accessed=int(bytes_accessed)),
    )(rs, src, mask, gv, ght)

    return loss_b[:, 0, 0].mean()


if __name__ == "__main__":
    key = jax.random.PRNGKey(0)
    k1, k2, k3 = jax.random.split(key, 3)
    B, C, H, W = 2, 4, 16, 16
    source = jax.random.uniform(k1, (B, C, H, W), dtype=jnp.float32)
    reference = jax.random.uniform(k2, (B, C, H, W), dtype=jnp.float32)
    flow_pred = jax.random.normal(k3, (B, 2, H, W), dtype=jnp.float32) * 1.5

    loss_fn = jax.jit(flow_photometric_loss)
    loss = jax.block_until_ready(loss_fn(source, reference, flow_pred))
    assert loss.shape == () and bool(jnp.isfinite(loss))
    print("KERNEL_OK")
</pallas_src>

<mosaic_0001>
module attributes {stable_mosaic.version = 11 : i64} {
  func.func private @main(%arg0: i32) attributes {dimension_semantics = [#tpu.dimension_semantics<core_parallel>], iteration_bounds = array<i64: 2>, tpu.core_type = #tpu.core_type<sc_scalar_subcore>, window_params = []} {
    return
  }
}

module attributes {stable_mosaic.version = 11 : i64} {
  func.func private @main(%arg0: i32) attributes {dimension_semantics = [#tpu.dimension_semantics<core_parallel>], iteration_bounds = array<i64: 2>, tpu.core_type = #tpu.core_type<sc_scalar_subcore>, window_params = []} {
    return
  }
}

module attributes {stable_mosaic.version = 11 : i64} {
  func.func @_fused_photometric_kernel(%arg0: i32, %arg1: memref<1x4x16x16xf32, #tpu.memory_space<vmem>>, %arg2: memref<1x4x16x16xf32, #tpu.memory_space<vmem>>, %arg3: memref<1x1x16x16xf32, #tpu.memory_space<vmem>>, %arg4: memref<16x16xf32, #tpu.memory_space<vmem>>, %arg5: memref<16x16xf32, #tpu.memory_space<vmem>>, %arg6: memref<1x1x128xf32, #tpu.memory_space<vmem>>) attributes {dimension_semantics = [#tpu.dimension_semantics<parallel>], iteration_bounds = array<i64: 2>, scalar_prefetch = 0 : i64, scratch_operands = 0 : i64, tpu.core_type = #tpu.core_type<tc>, window_params = [{transform_indices = @transform_0, window_bounds = array<i64: 1, 4, 16, 16>}, {transform_indices = @transform_1, window_bounds = array<i64: 1, 4, 16, 16>}, {transform_indices = @transform_2, window_bounds = array<i64: 1, 1, 16, 16>}, {pipeline_mode = #tpu.pipeline_mode<synchronous>, transform_indices = @transform_3, window_bounds = array<i64: 16, 16>}, {pipeline_mode = #tpu.pipeline_mode<synchronous>, transform_indices = @transform_4, window_bounds = array<i64: 16, 16>}, {transform_indices = @transform_5, window_bounds = array<i64: 1, 1, 128>}]} {
    %c0 = arith.constant 0 : index
    %c0_0 = arith.constant 0 : index
    %c0_1 = arith.constant 0 : index
    %c0_2 = arith.constant 0 : index
    %0 = vector.load %arg3[%c0, %c0_0, %c0_1, %c0_2] : memref<1x1x16x16xf32, #tpu.memory_space<vmem>>, vector<1x1x16x16xf32>
    %1 = vector.shape_cast %0 : vector<1x1x16x16xf32> to vector<16x16xf32>
    %c0_3 = arith.constant 0 : index
    %c0_4 = arith.constant 0 : index
    %2 = vector.load %arg4[%c0_3, %c0_4] : memref<16x16xf32, #tpu.memory_space<vmem>>, vector<16x16xf32>
    %c0_5 = arith.constant 0 : index
    %c0_6 = arith.constant 0 : index
    %3 = vector.load %arg5[%c0_5, %c0_6] : memref<16x16xf32, #tpu.memory_space<vmem>>, vector<16x16xf32>
    %c0_7 = arith.constant 0 : index
    %c0_8 = arith.constant 0 : index
    %c0_9 = arith.constant 0 : index
    %c0_10 = arith.constant 0 : index
    %4 = vector.load %arg1[%c0_7, %c0_8, %c0_9, %c0_10] : memref<1x4x16x16xf32, #tpu.memory_space<vmem>>, vector<1x1x16x16xf32>
    %5 = vector.shape_cast %4 : vector<1x1x16x16xf32> to vector<16x16xf32>
    %6 = arith.mulf %5, %1 : vector<16x16xf32>
    %c0_11 = arith.constant 0 : index
    %c0_12 = arith.constant 0 : index
    %c0_13 = arith.constant 0 : index
    %c0_14 = arith.constant 0 : index
    %7 = vector.load %arg2[%c0_11, %c0_12, %c0_13, %c0_14] : memref<1x4x16x16xf32, #tpu.memory_space<vmem>>, vector<1x1x16x16xf32>
    %8 = vector.shape_cast %7 : vector<1x1x16x16xf32> to vector<16x16xf32>
    %9 = arith.mulf %8, %1 : vector<16x16xf32>
    %10 = arith.subf %6, %9 : vector<16x16xf32>
    %11 = math.absf %10 : vector<16x16xf32>
    %12 = vector.shape_cast %11 : vector<16x16xf32> to vector<1x16x16xf32>
    %cst = arith.constant dense<0.000000e+00> : vector<1xf32>
    %13 = vector.multi_reduction <add>, %12, %cst [1, 2] : vector<1x16x16xf32> to vector<1xf32>
    %14 = vector.shape_cast %13 : vector<1xf32> to vector<1x1x1xf32>
    %15 = vector.extract %14[0, 0, 0] : f32 from vector<1x1x1xf32>
    %cst_15 = arith.constant 0.000000e+00 : f32
    %16 = arith.addf %cst_15, %15 : f32
    %cst_16 = arith.constant dense<0.000000e+00> : vector<16x16xf32>
    %17 = tpu.matmul %2, %6, %cst_16 {dimension_numbers = #tpu.dot_dimension_numbers<[1], [0], [0], [1], [0, 0, 1, 1], [], []>} : vector<16x16xf32>, vector<16x16xf32>, vector<16x16xf32> -> vector<16x16xf32>
    %cst_17 = arith.constant dense<0.000000e+00> : vector<16x16xf32>
    %18 = tpu.matmul %17, %3, %cst_17 {dimension_numbers = #tpu.dot_dimension_numbers<[1], [0], [0], [1], [0, 0, 1, 1], [], []>} : vector<16x16xf32>, vector<16x16xf32>, vector<16x16xf32> -> vector<16x16xf32>
    %cst_18 = arith.constant dense<0.000000e+00> : vector<16x16xf32>
    %19 = tpu.matmul %2, %9, %cst_18 {dimension_numbers = #tpu.dot_dimension_numbers<[1], [0], [0], [1], [0, 0, 1, 1], [], []>} : vector<16x16xf32>, vector<16x16xf32>, vector<16x16xf32> -> vector<16x16xf32>
    %cst_19 = arith.constant dense<0.000000e+00> : vector<16x16xf32>
    %20 = tpu.matmul %19, %3, %cst_19 {dimension_numbers = #tpu.dot_dimension_numbers<[1], [0], [0], [1], [0, 0, 1, 1], [], []>} : vector<16x16xf32>, vector<16x16xf32>, vector<16x16xf32> -> vector<16x16xf32>
    %21 = arith.mulf %6, %6 : vector<16x16xf32>
    %cst_20 = arith.constant dense<0.000000e+00> : vector<16x16xf32>
    %22 = tpu.matmul %2, %21, %cst_20 {dimension_numbers = #tpu.dot_dimension_numbers<[1], [0], [0], [1], [0, 0, 1, 1], [], []>} : vector<16x16xf32>, vector<16x16xf32>, vector<16x16xf32> -> vector<16x16xf32>
    %cst_21 = arith.constant dense<0.000000e+00> : vector<16x16xf32>
    %23 = tpu.matmul %22, %3, %cst_21 {dimension_numbers = #tpu.dot_dimension_numbers<[1], [0], [0], [1], [0, 0, 1, 1], [], []>} : vector<16x16xf32>, vector<16x16xf32>, vector<16x16xf32> -> vector<16x16xf32>
    %24 = arith.mulf %9, %9 : vector<16x16xf32>
    %cst_22 = arith.constant dense<0.000000e+00> : vector<16x16xf32>
    %25 = tpu.matmul %2, %24, %cst_22 {dimension_numbers = #tpu.dot_dimension_numbers<[1], [0], [0], [1], [0, 0, 1, 1], [], []>} : vector<16x16xf32>, vector<16x16xf32>, vector<16x16xf32> -> vector<16x16xf32>
    %cst_23 = arith.constant dense<0.000000e+00> : vector<16x16xf32>
    %26 = tpu.matmul %25, %3, %cst_23 {dimension_numbers = #tpu.dot_dimension_numbers<[1], [0], [0], [1], [0, 0, 1, 1], [], []>} : vector<16x16xf32>, vector<16x16xf32>, vector<16x16xf32> -> vector<16x16xf32>
    %27 = arith.mulf %6, %9 : vector<16x16xf32>
    %cst_24 = arith.constant dense<0.000000e+00> : vector<16x16xf32>
    %28 = tpu.matmul %2, %27, %cst_24 {dimension_numbers = #tpu.dot_dimension_numbers<[1], [0], [0], [1], [0, 0, 1, 1], [], []>} : vector<16x16xf32>, vector<16x16xf32>, vector<16x16xf32> -> vector<16x16xf32>
    %cst_25 = arith.constant dense<0.000000e+00> : vector<16x16xf32>
    %29 = tpu.matmul %28, %3, %cst_25 {dimension_numbers = #tpu.dot_dimension_numbers<[1], [0], [0], [1], [0, 0, 1, 1], [], []>} : vector<16x16xf32>, vector<16x16xf32>, vector<16x16xf32> -> vector<16x16xf32>
    %30 = arith.mulf %18, %18 : vector<16x16xf32>
    %31 = arith.mulf %20, %20 : vector<16x16xf32>
    %32 = arith.mulf %18, %20 : vector<16x16xf32>
    %33 = arith.subf %23, %30 : vector<16x16xf32>
    %34 = arith.subf %26, %31 : vector<16x16xf32>
    %35 = arith.subf %29, %32 : vector<16x16xf32>
    %cst_26 = arith.constant 2.000000e+00 : f32
    %36 = vector.broadcast %cst_26 : f32 to vector<16x16xf32>
    %37 = arith.mulf %36, %32 : vector<16x16xf32>
    %cst_27 = arith.constant 9.99999974E-5 : f32
    %38 = vector.broadcast %cst_27 : f32 to vector<16x16xf32>
    %39 = arith.addf %37, %38 : vector<16x16xf32>
    %cst_28 = arith.constant 2.000000e+00 : f32
    %40 = vector.broadcast %cst_28 : f32 to vector<16x16xf32>
    %41 = arith.mulf %40, %35 : vector<16x16xf32>
    %cst_29 = arith.constant 8.99999984E-4 : f32
    %42 = vector.broadcast %cst_29 : f32 to vector<16x16xf32>
    %43 = arith.addf %41, %42 : vector<16x16xf32>
    %44 = arith.mulf %39, %43 : vector<16x16xf32>
    %45 = arith.addf %30, %31 : vector<16x16xf32>
    %cst_30 = arith.constant 9.99999974E-5 : f32
    %46 = vector.broadcast %cst_30 : f32 to vector<16x16xf32>
    %47 = arith.addf %45, %46 : vector<16x16xf32>
    %48 = arith.addf %33, %34 : vector<16x16xf32>
    %cst_31 = arith.constant 8.99999984E-4 : f32
    %49 = vector.broadcast %cst_31 : f32 to vector<16x16xf32>
    %50 = arith.addf %48, %49 : vector<16x16xf32>
    %51 = arith.mulf %47, %50 : vector<16x16xf32>
    %cst_32 = arith.constant 9.99999996E-13 : f32
    %52 = vector.broadcast %cst_32 : f32 to vector<16x16xf32>
    %53 = arith.addf %51, %52 : vector<16x16xf32>
    %54 = arith.divf %44, %53 : vector<16x16xf32>
    %55 = vector.shape_cast %54 : vector<16x16xf32> to vector<1x16x16xf32>
    %cst_33 = arith.constant dense<0.000000e+00> : vector<1xf32>
    %56 = vector.multi_reduction <add>, %55, %cst_33 [1, 2] : vector<1x16x16xf32> to vector<1xf32>
    %57 = vector.shape_cast %56 : vector<1xf32> to vector<1x1x1xf32>
    %58 = vector.extract %57[0, 0, 0] : f32 from vector<1x1x1xf32>
    %cst_34 = arith.constant 0.000000e+00 : f32
    %59 = arith.addf %cst_34, %58 : f32
    %c0_35 = arith.constant 0 : index
    %c1 = arith.constant 1 : index
    %c0_36 = arith.constant 0 : index
    %c0_37 = arith.constant 0 : index
    %60 = vector.load %arg1[%c0_35, %c1, %c0_36, %c0_37] : memref<1x4x16x16xf32, #tpu.memory_space<vmem>>, vector<1x1x16x16xf32>
    %61 = vector.shape_cast %60 : vector<1x1x16x16xf32> to vector<16x16xf32>
    %62 = arith.mulf %61, %1 : vector<16x16xf32>
    %c0_38 = arith.constant 0 : index
    %c1_39 = arith.constant 1 : index
    %c0_40 = arith.constant 0 : index
    %c0_41 = arith.constant 0 : index
    %63 = vector.load %arg2[%c0_38, %c1_39, %c0_40, %c0_41] : memref<1x4x16x16xf32, #tpu.memory_space<vmem>>, vector<1x1x16x16xf32>
    %64 = vector.shape_cast %63 : vector<1x1x16x16xf32> to vector<16x16xf32>
    %65 = arith.mulf %64, %1 : vector<16x16xf32>
    %66 = arith.subf %62, %65 : vector<16x16xf32>
    %67 = math.absf %66 : vector<16x16xf32>
    %68 = vector.shape_cast %67 : vector<16x16xf32> to vector<1x16x16xf32>
    %cst_42 = arith.constant dense<0.000000e+00> : vector<1xf32>
    %69 = vector.multi_reduction <add>, %68, %cst_42 [1, 2] : vector<1x16x16xf32> to vector<1xf32>
    %70 = vector.shape_cast %69 : vector<1xf32> to vector<1x1x1xf32>
    %71 = vector.extract %70[0, 0, 0] : f32 from vector<1x1x1xf32>
    %72 = arith.addf %16, %71 : f32
    %cst_43 = arith.constant dense<0.000000e+00> : vector<16x16xf32>
    %73 = tpu.matmul %2, %62, %cst_43 {dimension_numbers = #tpu.dot_dimension_numbers<[1], [0], [0], [1], [0, 0, 1, 1], [], []>} : vector<16x16xf32>, vector<16x16xf32>, vector<16x16xf32> -> vector<16x16xf32>
    %cst_44 = arith.constant dense<0.000000e+00> : vector<16x16xf32>
    %74 = tpu.matmul %73, %3, %cst_44 {dimension_numbers = #tpu.dot_dimension_numbers<[1], [0], [0], [1], [0, 0, 1, 1], [], []>} : vector<16x16xf32>, vector<16x16xf32>, vector<16x16xf32> -> vector<16x16xf32>
    %cst_45 = arith.constant dense<0.000000e+00> : vector<16x16xf32>
    %75 = tpu.matmul %2, %65, %cst_45 {dimension_numbers = #tpu.dot_dimension_numbers<[1], [0], [0], [1], [0, 0, 1, 1], [], []>} : vector<16x16xf32>, vector<16x16xf32>, vector<16x16xf32> -> vector<16x16xf32>
    %cst_46 = arith.constant dense<0.000000e+00> : vector<16x16xf32>
    %76 = tpu.matmul %75, %3, %cst_46 {dimension_numbers = #tpu.dot_dimension_numbers<[1], [0], [0], [1], [0, 0, 1, 1], [], []>} : vector<16x16xf32>, vector<16x16xf32>, vector<16x16xf32> -> vector<16x16xf32>
    %77 = arith.mulf %62, %62 : vector<16x16xf32>
    %cst_47 = arith.constant dense<0.000000e+00> : vector<16x16xf32>
    %78 = tpu.matmul %2, %77, %cst_47 {dimension_numbers = #tpu.dot_dimension_numbers<[1], [0], [0], [1], [0, 0, 1, 1], [], []>} : vector<16x16xf32>, vector<16x16xf32>, vector<16x16xf32> -> vector<16x16xf32>
    %cst_48 = arith.constant dense<0.000000e+00> : vector<16x16xf32>
    %79 = tpu.matmul %78, %3, %cst_48 {dimension_numbers = #tpu.dot_dimension_numbers<[1], [0], [0], [1], [0, 0, 1, 1], [], []>} : vector<16x16xf32>, vector<16x16xf32>, vector<16x16xf32> -> vector<16x16xf32>
    %80 = arith.mulf %65, %65 : vector<16x16xf32>
    %cst_49 = arith.constant dense<0.000000e+00> : vector<16x16xf32>
    %81 = tpu.matmul %2, %80, %cst_49 {dimension_numbers = #tpu.dot_dimension_numbers<[1], [0], [0], [1], [0, 0, 1, 1], [], []>} : vector<16x16xf32>, vector<16x16xf32>, vector<16x16xf32> -> vector<16x16xf32>
    %cst_50 = arith.constant dense<0.000000e+00> : vector<16x16xf32>
    %82 = tpu.matmul %81, %3, %cst_50 {dimension_numbers = #tpu.dot_dimension_numbers<[1], [0], [0], [1], [0, 0, 1, 1], [], []>} : vector<16x16xf32>, vector<16x16xf32>, vector<16x16xf32> -> vector<16x16xf32>
    %83 = arith.mulf %62, %65 : vector<16x16xf32>
    %cst_51 = arith.constant dense<0.000000e+00> : vector<16x16xf32>
    %84 = tpu.matmul %2, %83, %cst_51 {dimension_numbers = #tpu.dot_dimension_numbers<[1], [0], [0], [1], [0, 0, 1, 1], [], []>} : vector<16x16xf32>, vector<16x16xf32>, vector<16x16xf32> -> vector<16x16xf32>
    %cst_52 = arith.constant dense<0.000000e+00> : vector<16x16xf32>
    %85 = tpu.matmul %84, %3, %cst_52 {dimension_numbers = #tpu.dot_dimension_numbers<[1], [0], [0], [1], [0, 0, 1, 1], [], []>} : vector<16x16xf32>, vector<16x16xf32>, vector<16x16xf32> -> vector<16x16xf32>
    %86 = arith.mulf %74, %74 : vector<16x16xf32>
    %87 = arith.mulf %76, %76 : vector<16x16xf32>
    %88 = arith.mulf %74, %76 : vector<16x16xf32>
    %89 = arith.subf %79, %86 : vector<16x16xf32>
    %90 = arith.subf %82, %87 : vector<16x16xf32>
    %91 = arith.subf %85, %88 : vector<16x16xf32>
    %cst_53 = arith.constant 2.000000e+00 : f32
    %92 = vector.broadcast %cst_53 : f32 to vector<16x16xf32>
    %93 = arith.mulf %92, %88 : vector<16x16xf32>
    %cst_54 = arith.constant 9.99999974E-5 : f32
    %94 = vector.broadcast %cst_54 : f32 to vector<16x16xf32>
    %95 = arith.addf %93, %94 : vector<16x16xf32>
    %cst_55 = arith.constant 2.000000e+00 : f32
    %96 = vector.broadcast %cst_55 : f32 to vector<16x16xf32>
    %97 = arith.mulf %96, %91 : vector<16x16xf32>
    %cst_56 = arith.constant 8.99999984E-4 : f32
    %98 = vector.broadcast %cst_56 : f32 to vector<16x16xf32>
    %99 = arith.addf %97, %98 : vector<16x16xf32>
    %100 = arith.mulf %95, %99 : vector<16x16xf32>
    %101 = arith.addf %86, %87 : vector<16x16xf32>
    %cst_57 = arith.constant 9.99999974E-5 : f32
    %102 = vector.broadcast %cst_57 : f32 to vector<16x16xf32>
    %103 = arith.addf %101, %102 : vector<16x16xf32>
    %104 = arith.addf %89, %90 : vector<16x16xf32>
    %cst_58 = arith.constant 8.99999984E-4 : f32
    %105 = vector.broadcast %cst_58 : f32 to vector<16x16xf32>
    %106 = arith.addf %104, %105 : vector<16x16xf32>
    %107 = arith.mulf %103, %106 : vector<16x16xf32>
    %cst_59 = arith.constant 9.99999996E-13 : f32
    %108 = vector.broadcast %cst_59 : f32 to vector<16x16xf32>
    %109 = arith.addf %107, %108 : vector<16x16xf32>
    %110 = arith.divf %100, %109 : vector<16x16xf32>
    %111 = vector.shape_cast %110 : vector<16x16xf32> to vector<1x16x16xf32>
    %cst_60 = arith.constant dense<0.000000e+00> : vector<1xf32>
    %112 = vector.multi_reduction <add>, %111, %cst_60 [1, 2] : vector<1x16x16xf32> to vector<1xf32>
    %113 = vector.shape_cast %112 : vector<1xf32> to vector<1x1x1xf32>
    %114 = vector.extract %113[0, 0, 0] : f32 from vector<1x1x1xf32>
    %115 = arith.addf %59, %114 : f32
    %c0_61 = arith.constant 0 : index
    %c2 = arith.constant 2 : index
    %c0_62 = arith.constant 0 : index
    %c0_63 = arith.constant 0 : index
    %116 = vector.load %arg1[%c0_61, %c2, %c0_62, %c0_63] : memref<1x4x16x16xf32, #tpu.memory_space<vmem>>, vector<1x1x16x16xf32>
    %117 = vector.shape_cast %116 : vector<1x1x16x16xf32> to vector<16x16xf32>
    %118 = arith.mulf %117, %1 : vector<16x16xf32>
    %c0_64 = arith.constant 0 : index
    %c2_65 = arith.constant 2 : index
    %c0_66 = arith.constant 0 : index
    %c0_67 = arith.constant 0 : index
    %119 = vector.load %arg2[%c0_64, %c2_65, %c0_66, %c0_67] : memref<1x4x16x16xf32, #tpu.memory_space<vmem>>, vector<1x1x16x16xf32>
    %120 = vector.shape_cast %119 : vector<1x1x16x16xf32> to vector<16x16xf32>
    %121 = arith.mulf %120, %1 : vector<16x16xf32>
    %122 = arith.subf %118, %121 : vector<16x16xf32>
    %123 = math.absf %122 : vector<16x16xf32>
    %124 = vector.shape_cast %123 : vector<16x16xf32> to vector<1x16x16xf32>
    %cst_68 = arith.constant dense<0.000000e+00> : vector<1xf32>
    %125 = vector.multi_reduction <add>, %124, %cst_68 [1, 2] : vector<1x16x16xf32> to vector<1xf32>
    %126 = vector.shape_cast %125 : vector<1xf32> to vector<1x1x1xf32>
    %127 = vector.extract %126[0, 0, 0] : f32 from vector<1x1x1xf32>
    %128 = arith.addf %72, %127 : f32
    %cst_69 = arith.constant dense<0.000000e+00> : vector<16x16xf32>
    %129 = tpu.matmul %2, %118, %cst_69 {dimension_numbers = #tpu.dot_dimension_numbers<[1], [0], [0], [1], [0, 0, 1, 1], [], []>} : vector<16x16xf32>, vector<16x16xf32>, vector<16x16xf32> -> vector<16x16xf32>
    %cst_70 = arith.constant dense<0.000000e+00> : vector<16x16xf32>
    %130 = tpu.matmul %129, %3, %cst_70 {dimension_numbers = #tpu.dot_dimension_numbers<[1], [0], [0], [1], [0, 0, 1, 1], [], []>} : vector<16x16xf32>, vector<16x16xf32>, vector<16x16xf32> -> vector<16x16xf32>
    %cst_71 = arith.constant dense<0.000000e+00> : vector<16x16xf32>
    %131 = tpu.matmul %2, %121, %cst_71 {dimension_numbers = #tpu.dot_dimension_numbers<[1], [0], [0], [1], [0, 0, 1, 1], [], []>} : vector<16x16xf32>, vector<16x16xf32>, vector<16x16xf32> -> vector<16x16xf32>
    %cst_72 = arith.constant dense<0.000000e+00> : vector<16x16xf32>
    %132 = tpu.matmul %131, %3, %cst_72 {dimension_numbers = #tpu.dot_dimension_numbers<[1], [0], [0], [1], [0, 0, 1, 1], [], []>} : vector<16x16xf32>, vector<16x16xf32>, vector<16x16xf32> -> vector<16x16xf32>
    %133 = arith.mulf %118, %118 : vector<16x16xf32>
    %cst_73 = arith.constant dense<0.000000e+00> : vector<16x16xf32>
    %134 = tpu.matmul %2, %133, %cst_73 {dimension_numbers = #tpu.dot_dimension_numbers<[1], [0], [0], [1], [0, 0, 1, 1], [], []>} : vector<16x16xf32>, vector<16x16xf32>, vector<16x16xf32> -> vector<16x16xf32>
    %cst_74 = arith.constant dense<0.000000e+00> : vector<16x16xf32>
    %135 = tpu.matmul %134, %3, %cst_74 {dimension_numbers = #tpu.dot_dimension_numbers<[1], [0], [0], [1], [0, 0, 1, 1], [], []>} : vector<16x16xf32>, vector<16x16xf32>, vector<16x16xf32> -> vector<16x16xf32>
    %136 = arith.mulf %121, %121 : vector<16x16xf32>
    %cst_75 = arith.constant dense<0.000000e+00> : vector<16x16xf32>
    %137 = tpu.matmul %2, %136, %cst_75 {dimension_numbers = #tpu.dot_dimension_numbers<[1], [0], [0], [1], [0, 0, 1, 1], [], []>} : vector<16x16xf32>, vector<16x16xf32>, vector<16x16xf32> -> vector<16x16xf32>
    %cst_76 = arith.constant dense<0.000000e+00> : vector<16x16xf32>
    %138 = tpu.matmul %137, %3, %cst_76 {dimension_numbers = #tpu.dot_dimension_numbers<[1], [0], [0], [1], [0, 0, 1, 1], [], []>} : vector<16x16xf32>, vector<16x16xf32>, vector<16x16xf32> -> vector<16x16xf32>
    %139 = arith.mulf %118, %121 : vector<16x16xf32>
    %cst_77 = arith.constant dense<0.000000e+00> : vector<16x16xf32>
    %140 = tpu.matmul %2, %139, %cst_77 {dimension_numbers = #tpu.dot_dimension_numbers<[1], [0], [0], [1], [0, 0, 1, 1], [], []>} : vector<16x16xf32>, vector<16x16xf32>, vector<16x16xf32> -> vector<16x16xf32>
    %cst_78 = arith.constant dense<0.000000e+00> : vector<16x16xf32>
    %141 = tpu.matmul %140, %3, %cst_78 {dimension_numbers = #tpu.dot_dimension_numbers<[1], [0], [0], [1], [0, 0, 1, 1], [], []>} : vector<16x16xf32>, vector<16x16xf32>, vector<16x16xf32> -> vector<16x16xf32>
    %142 = arith.mulf %130, %130 : vector<16x16xf32>
    %143 = arith.mulf %132, %132 : vector<16x16xf32>
    %144 = arith.mulf %130, %132 : vector<16x16xf32>
    %145 = arith.subf %135, %142 : vector<16x16xf32>
    %146 = arith.subf %138, %143 : vector<16x16xf32>
    %147 = arith.subf %141, %144 : vector<16x16xf32>
    %cst_79 = arith.constant 2.000000e+00 : f32
    %148 = vector.broadcast %cst_79 : f32 to vector<16x16xf32>
    %149 = arith.mulf %148, %144 : vector<16x16xf32>
    %cst_80 = arith.constant 9.99999974E-5 : f32
    %150 = vector.broadcast %cst_80 : f32 to vector<16x16xf32>
    %151 = arith.addf %149, %150 : vector<16x16xf32>
    %cst_81 = arith.constant 2.000000e+00 : f32
    %152 = vector.broadcast %cst_81 : f32 to vector<16x16xf32>
    %153 = arith.mulf %152, %147 : vector<16x16xf32>
    %cst_82 = arith.constant 8.99999984E-4 : f32
    %154 = vector.broadcast %cst_82 : f32 to vector<16x16xf32>
    %155 = arith.addf %153, %154 : vector<16x16xf32>
    %156 = arith.mulf %151, %155 : vector<16x16xf32>
    %157 = arith.addf %142, %143 : vector<16x16xf32>
    %cst_83 = arith.constant 9.99999974E-5 : f32
    %158 = vector.broadcast %cst_83 : f32 to vector<16x16xf32>
    %159 = arith.addf %157, %158 : vector<16x16xf32>
    %160 = arith.addf %145, %146 : vector<16x16xf32>
    %cst_84 = arith.constant 8.99999984E-4 : f32
    %161 = vector.broadcast %cst_84 : f32 to vector<16x16xf32>
    %162 = arith.addf %160, %161 : vector<16x16xf32>
    %163 = arith.mulf %159, %162 : vector<16x16xf32>
    %cst_85 = arith.constant 9.99999996E-13 : f32
    %164 = vector.broadcast %cst_85 : f32 to vector<16x16xf32>
    %165 = arith.addf %163, %164 : vector<16x16xf32>
    %166 = arith.divf %156, %165 : vector<16x16xf32>
    %167 = vector.shape_cast %166 : vector<16x16xf32> to vector<1x16x16xf32>
    %cst_86 = arith.constant dense<0.000000e+00> : vector<1xf32>
    %168 = vector.multi_reduction <add>, %167, %cst_86 [1, 2] : vector<1x16x16xf32> to vector<1xf32>
    %169 = vector.shape_cast %168 : vector<1xf32> to vector<1x1x1xf32>
    %170 = vector.extract %169[0, 0, 0] : f32 from vector<1x1x1xf32>
    %171 = arith.addf %115, %170 : f32
    %c0_87 = arith.constant 0 : index
    %c3 = arith.constant 3 : index
    %c0_88 = arith.constant 0 : index
    %c0_89 = arith.constant 0 : index
    %172 = vector.load %arg1[%c0_87, %c3, %c0_88, %c0_89] : memref<1x4x16x16xf32, #tpu.memory_space<vmem>>, vector<1x1x16x16xf32>
    %173 = vector.shape_cast %172 : vector<1x1x16x16xf32> to vector<16x16xf32>
    %174 = arith.mulf %173, %1 : vector<16x16xf32>
    %c0_90 = arith.constant 0 : index
    %c3_91 = arith.constant 3 : index
    %c0_92 = arith.constant 0 : index
    %c0_93 = arith.constant 0 : index
    %175 = vector.load %arg2[%c0_90, %c3_91, %c0_92, %c0_93] : memref<1x4x16x16xf32, #tpu.memory_space<vmem>>, vector<1x1x16x16xf32>
    %176 = vector.shape_cast %175 : vector<1x1x16x16xf32> to vector<16x16xf32>
    %177 = arith.mulf %176, %1 : vector<16x16xf32>
    %178 = arith.subf %174, %177 : vector<16x16xf32>
    %179 = math.absf %178 : vector<16x16xf32>
    %180 = vector.shape_cast %179 : vector<16x16xf32> to vector<1x16x16xf32>
    %cst_94 = arith.constant dense<0.000000e+00> : vector<1xf32>
    %181 = vector.multi_reduction <add>, %180, %cst_94 [1, 2] : vector<1x16x16xf32> to vector<1xf32>
    %182 = vector.shape_cast %181 : vector<1xf32> to vector<1x1x1xf32>
    %183 = vector.extract %182[0, 0, 0] : f32 from vector<1x1x1xf32>
    %184 = arith.addf %128, %183 : f32
    %cst_95 = arith.constant dense<0.000000e+00> : vector<16x16xf32>
    %185 = tpu.matmul %2, %174, %cst_95 {dimension_numbers = #tpu.dot_dimension_numbers<[1], [0], [0], [1], [0, 0, 1, 1], [], []>} : vector<16x16xf32>, vector<16x16xf32>, vector<16x16xf32> -> vector<16x16xf32>
    %cst_96 = arith.constant dense<0.000000e+00> : vector<16x16xf32>
    %186 = tpu.matmul %185, %3, %cst_96 {dimension_numbers = #tpu.dot_dimension_numbers<[1], [0], [0], [1], [0, 0, 1, 1], [], []>} : vector<16x16xf32>, vector<16x16xf32>, vector<16x16xf32> -> vector<16x16xf32>
    %cst_97 = arith.constant dense<0.000000e+00> : vector<16x16xf32>
    %187 = tpu.matmul %2, %177, %cst_97 {dimension_numbers = #tpu.dot_dimension_numbers<[1], [0], [0], [1], [0, 0, 1, 1], [], []>} : vector<16x16xf32>, vector<16x16xf32>, vector<16x16xf32> -> vector<16x16xf32>
    %cst_98 = arith.constant dense<0.000000e+00> : vector<16x16xf32>
    %188 = tpu.matmul %187, %3, %cst_98 {dimension_numbers = #tpu.dot_dimension_numbers<[1], [0], [0], [1], [0, 0, 1, 1], [], []>} : vector<16x16xf32>, vector<16x16xf32>, vector<16x16xf32> -> vector<16x16xf32>
    %189 = arith.mulf %174, %174 : vector<16x16xf32>
    %cst_99 = arith.constant dense<0.000000e+00> : vector<16x16xf32>
    %190 = tpu.matmul %2, %189, %cst_99 {dimension_numbers = #tpu.dot_dimension_numbers<[1], [0], [0], [1], [0, 0, 1, 1], [], []>} : vector<16x16xf32>, vector<16x16xf32>, vector<16x16xf32> -> vector<16x16xf32>
    %cst_100 = arith.constant dense<0.000000e+00> : vector<16x16xf32>
    %191 = tpu.matmul %190, %3, %cst_100 {dimension_numbers = #tpu.dot_dimension_numbers<[1], [0], [0], [1], [0, 0, 1, 1], [], []>} : vector<16x16xf32>, vector<16x16xf32>, vector<16x16xf32> -> vector<16x16xf32>
    %192 = arith.mulf %177, %177 : vector<16x16xf32>
    %cst_101 = arith.constant dense<0.000000e+00> : vector<16x16xf32>
    %193 = tpu.matmul %2, %192, %cst_101 {dimension_numbers = #tpu.dot_dimension_numbers<[1], [0], [0], [1], [0, 0, 1, 1], [], []>} : vector<16x16xf32>, vector<16x16xf32>, vector<16x16xf32> -> vector<16x16xf32>
    %cst_102 = arith.constant dense<0.000000e+00> : vector<16x16xf32>
    %194 = tpu.matmul %193, %3, %cst_102 {dimension_numbers = #tpu.dot_dimension_numbers<[1], [0], [0], [1], [0, 0, 1, 1], [], []>} : vector<16x16xf32>, vector<16x16xf32>, vector<16x16xf32> -> vector<16x16xf32>
    %195 = arith.mulf %174, %177 : vector<16x16xf32>
    %cst_103 = arith.constant dense<0.000000e+00> : vector<16x16xf32>
    %196 = tpu.matmul %2, %195, %cst_103 {dimension_numbers = #tpu.dot_dimension_numbers<[1], [0], [0], [1], [0, 0, 1, 1], [], []>} : vector<16x16xf32>, vector<16x16xf32>, vector<16x16xf32> -> vector<16x16xf32>
    %cst_104 = arith.constant dense<0.000000e+00> : vector<16x16xf32>
    %197 = tpu.matmul %196, %3, %cst_104 {dimension_numbers = #tpu.dot_dimension_numbers<[1], [0], [0], [1], [0, 0, 1, 1], [], []>} : vector<16x16xf32>, vector<16x16xf32>, vector<16x16xf32> -> vector<16x16xf32>
    %198 = arith.mulf %186, %186 : vector<16x16xf32>
    %199 = arith.mulf %188, %188 : vector<16x16xf32>
    %200 = arith.mulf %186, %188 : vector<16x16xf32>
    %201 = arith.subf %191, %198 : vector<16x16xf32>
    %202 = arith.subf %194, %199 : vector<16x16xf32>
    %203 = arith.subf %197, %200 : vector<16x16xf32>
    %cst_105 = arith.constant 2.000000e+00 : f32
    %204 = vector.broadcast %cst_105 : f32 to vector<16x16xf32>
    %205 = arith.mulf %204, %200 : vector<16x16xf32>
    %cst_106 = arith.constant 9.99999974E-5 : f32
    %206 = vector.broadcast %cst_106 : f32 to vector<16x16xf32>
    %207 = arith.addf %205, %206 : vector<16x16xf32>
    %cst_107 = arith.constant 2.000000e+00 : f32
    %208 = vector.broadcast %cst_107 : f32 to vector<16x16xf32>
    %209 = arith.mulf %208, %203 : vector<16x16xf32>
    %cst_108 = arith.constant 8.99999984E-4 : f32
    %210 = vector.broadcast %cst_108 : f32 to vector<16x16xf32>
    %211 = arith.addf %209, %210 : vector<16x16xf32>
    %212 = arith.mulf %207, %211 : vector<16x16xf32>
    %213 = arith.addf %198, %199 : vector<16x16xf32>
    %cst_109 = arith.constant 9.99999974E-5 : f32
    %214 = vector.broadcast %cst_109 : f32 to vector<16x16xf32>
    %215 = arith.addf %213, %214 : vector<16x16xf32>
    %216 = arith.addf %201, %202 : vector<16x16xf32>
    %cst_110 = arith.constant 8.99999984E-4 : f32
    %217 = vector.broadcast %cst_110 : f32 to vector<16x16xf32>
    %218 = arith.addf %216, %217 : vector<16x16xf32>
    %219 = arith.mulf %215, %218 : vector<16x16xf32>
    %cst_111 = arith.constant 9.99999996E-13 : f32
    %220 = vector.broadcast %cst_111 : f32 to vector<16x16xf32>
    %221 = arith.addf %219, %220 : vector<16x16xf32>
    %222 = arith.divf %212, %221 : vector<16x16xf32>
    %223 = vector.shape_cast %222 : vector<16x16xf32> to vector<1x16x16xf32>
    %cst_112 = arith.constant dense<0.000000e+00> : vector<1xf32>
    %224 = vector.multi_reduction <add>, %223, %cst_112 [1, 2] : vector<1x16x16xf32> to vector<1xf32>
    %225 = vector.shape_cast %224 : vector<1xf32> to vector<1x1x1xf32>
    %226 = vector.extract %225[0, 0, 0] : f32 from vector<1x1x1xf32>
    %227 = arith.addf %171, %226 : f32
    %cst_113 = arith.constant 9.765625E-4 : f32
    %228 = arith.mulf %184, %cst_113 : f32
    %cst_114 = arith.constant 9.765625E-4 : f32
    %229 = arith.mulf %227, %cst_114 : f32
    %cst_115 = arith.constant 1.000000e+00 : f32
    %230 = arith.subf %cst_115, %229 : f32
    %cst_116 = arith.constant 1.500000e-01 : f32
    %231 = arith.mulf %cst_116, %228 : f32
    %cst_117 = arith.constant 8.500000e-01 : f32
    %232 = arith.mulf %cst_117, %230 : f32
    %233 = arith.addf %231, %232 : f32
    %234 = vector.broadcast %233 : f32 to vector<1x128xf32>
    %c0_118 = arith.constant 0 : index
    %c0_119 = arith.constant 0 : index
    %c0_120 = arith.constant 0 : index
    %235 = vector.load %arg6[%c0_118, %c0_119, %c0_120] : memref<1x1x128xf32, #tpu.memory_space<vmem>>, vector<1x1x128xf32>
    %236 = vector.shape_cast %235 : vector<1x1x128xf32> to vector<1x128xf32>
    %237 = vector.shape_cast %234 : vector<1x128xf32> to vector<1x1x128xf32>
    tpu.vector_store %arg6[%c0_118, %c0_119, %c0_120], %237 {strides = array<i32>} : memref<1x1x128xf32, #tpu.memory_space<vmem>>, vector<1x1x128xf32>,
    return
  }
  func.func @transform_0(%arg0: i32) -> (i32, i32, i32, i32) {
    %c0_i32 = arith.constant 0 : i32
    %c0_i32_0 = arith.constant 0 : i32
    %c0_i32_1 = arith.constant 0 : i32
    %c0_i32_2 = arith.constant 0 : i32
    return %arg0, %c0_i32, %c0_i32_0, %c0_i32_1 : i32, i32, i32, i32
  }
  func.func @transform_1(%arg0: i32) -> (i32, i32, i32, i32) {
    %c0_i32 = arith.constant 0 : i32
    %c0_i32_0 = arith.constant 0 : i32
    %c0_i32_1 = arith.constant 0 : i32
    %c0_i32_2 = arith.constant 0 : i32
    return %arg0, %c0_i32, %c0_i32_0, %c0_i32_1 : i32, i32, i32, i32
  }
  func.func @transform_2(%arg0: i32) -> (i32, i32, i32, i32) {
    %c0_i32 = arith.constant 0 : i32
    %c0_i32_0 = arith.constant 0 : i32
    %c0_i32_1 = arith.constant 0 : i32
    %c0_i32_2 = arith.constant 0 : i32
    return %arg0, %c0_i32, %c0_i32_0, %c0_i32_1 : i32, i32, i32, i32
  }
  func.func @transform_3(%arg0: i32) -> (i32, i32) {
    %c0_i32 = arith.constant 0 : i32
    %c0_i32_0 = arith.constant 0 : i32
    %c0_i32_1 = arith.constant 0 : i32
    return %c0_i32, %c0_i32_0 : i32, i32
  }
  func.func @transform_4(%arg0: i32) -> (i32, i32) {
    %c0_i32 = arith.constant 0 : i32
    %c0_i32_0 = arith.constant 0 : i32
    %c0_i32_1 = arith.constant 0 : i32
    return %c0_i32, %c0_i32_0 : i32, i32
  }
  func.func @transform_5(%arg0: i32) -> (i32, i32, i32) {
    %c0_i32 = arith.constant 0 : i32
    %c0_i32_0 = arith.constant 0 : i32
    %c0_i32_1 = arith.constant 0 : i32
    return %arg0, %c0_i32, %c0_i32_0 : i32, i32, i32
  }
}

</mosaic_0001>

<bundles_post_ra>
// kernel: flow_photometric_loss.1
= control target key start
LH: loop header
LB: loop body
LE: loop exit
PB: predicated region body
PF: predicated region fallthrough
CT: control target
= control target key end

     0   :  { %s4593_s18 = smov 0   ;;  %s4967_s0 = inlined_call_operand.vmem [shape: f32[2,4,16,16], index: 0, kind: input, shape index: {}]   ;;  %s4968_s1 = inlined_call_operand.vmem [shape: f32[2,4,16,16], index: 1, kind: input, shape index: {}]   ;;  %s4969_s2 = inlined_call_operand.vmem [shape: f32[2,1,16,16], index: 2, kind: input, shape index: {}]   ;;  %s4970_s3 = inlined_call_operand.vmem [shape: f32[16,16], index: 3, kind: input, shape index: {}]   ;;  %s4971_s4 = inlined_call_operand.vmem [shape: f32[16,16], index: 4, kind: input, shape index: {}]   ;;  %s4972_s5 = inlined_call_operand.vmem [shape: f32[2,1,128], index: 5, kind: output, shape index: {}]  }
   0x1 LB: > { %s3807_s19 = sadd.s32 4294967295, %s4561_s18   ;;  %p3811_p0 = scmp.ge.s32.totalorder %s4561_s18, 1  ;;  %s4561_s18 = sphi %s4593_s18, %s15_s18  }
   0x2   : > { %p207_p1 = scmp.lt.s32.totalorder %s4561_s18, 3 }
   0x4   : > { %p208_p2 = pnand %p3811_p0, %p207_p1 }
   0x5   : > { %p243_p3 = scmp.lt.s32.totalorder (!%p208_p2), %s3807_s19, 1  ;;  %v4604_v0 = vld [vmem:[%s4970_s3] sm:$0xff] (!%p208_p2)  ;;  %vm279_vm0 = vcmask (!%p208_p2), 130048   ;;  %v266_v2 = vld [vmem:[%s4971_s4 + $0x8] sm:$0xff] (!%p208_p2) }
   0x6   : > { %211 = sbr.rel (%p208_p2) target bundleno = 768 (0x300), region = 40  ;;  %v265_v1 = vld [vmem:[%s4971_s4] sm:$0xff] (!%p208_p2)  ;;  %4079 = vmatprep.mubr.msk.f32.mxu0 (!%p208_p2), %vm279_vm0, %v4604_v0  ;;  %v4667_v18 = vld [vmem:[%s4970_s3 + $0x8] sm:$0xff] (!%p208_p2) }
   0x7   : > { %v4616_v3 = vpack.c.bf16 (!%p208_p2), %v266_v2, %v265_v1 }
   0x9   : > { %4360 = vmatprep.subr.bf16.mxu1 (!%p208_p2), %v4616_v3 }
   0xa   : > { %4362 = vmatpush3.bf16.msra.mxu1 (!%p208_p2), %v4616_v3 }
   0xb   : > { %4368 = vmatprep.subr.bf16.mxu1 (!%p208_p2), %v4616_v3 }
   0xd   : > { %s4974_s19 = smov (!%p243_p3, %s3807_s19), 1 }
   0xe   : > { %s3912_s26 = sshll.u32 %s4974_s19, 6  ;;  %s3914_s27 = sshll.u32 %s4974_s19, 4 }
   0xf   : > { %s4624_s30 = scalar_lea.vmem %s4967_s0, %s3912_s26  ;;  %s4629_s8 = scalar_lea.vmem %s4968_s1, %s3912_s26 }
  0x10   : > { %s257_s11 = scalar_lea.vmem %s4969_s2, %s3914_s27  ;;  %v267_v4 = vld [vmem:[%s4624_s30] sm:$0xff]  ;;  %v268_v5 = vld [vmem:[%s4624_s30 + $0x8] sm:$0xff]  ;;  %v3838_v25 = vld [vmem:[%s4624_s30 + $0x10] sm:$0xff]  ;;  %s260_s12 = scalar_lea.vmem %s4972_s5, %s4974_s19 }
  0x11   : > { %v271_v6 = vld [vmem:[%s4629_s8] sm:$0xff]  ;;  %v4641_v8 = vld [vmem:[%s257_s11 + $0x8] sm:$0xff]  ;;  %v3839_v26 = vld [vmem:[%s4624_s30 + $0x18] sm:$0xff] }
  0x12   : > { %v4639_v7 = vld [vmem:[%s257_s11] sm:$0xff]  ;;  %v272_v9 = vld [vmem:[%s4629_s8 + $0x8] sm:$0xff]  ;;  %v4648_v11 = vmul.f32 %v268_v5, %v4641_v8  ;;  %v4691_v29 = vmul.f32 %v3839_v26, %v4641_v8  ;;  %v3840_v30 = vld [vmem:[%s4629_s8 + $0x10] sm:$0xff] }
  0x13   : > { %v4645_v10 = vmul.f32 %v267_v4, %v4639_v7  ;;  %v4651_v12 = vmul.f32 %v271_v6, %v4639_v7  ;;  %v4654_v13 = vmul.f32 %v272_v9, %v4641_v8  ;;  %v4688_v28 = vmul.f32 %v3838_v25, %v4639_v7  ;;  %v3841_v31 = vld [vmem:[%s4629_s8 + $0x18] sm:$0xff]  ;;  %v3862_v44 = vld [vmem:[%s4624_s30 + $0x20] sm:$0xff]  ;;  %v3863_v45 = vld [vmem:[%s4624_s30 + $0x28] sm:$0xff] }
  0x14   : > { %v612_v17 = vmul.f32 %v4648_v11, %v4648_v11  ;;  %v4702_v33 = vmul.f32 %v3840_v30, %v4639_v7  ;;  %v4705_v34 = vmul.f32 %v3841_v31, %v4641_v8  ;;  %v1476_v37 = vmul.f32 %v4691_v29, %v4691_v29  ;;  %v3864_v49 = vld [vmem:[%s4629_s8 + $0x20] sm:$0xff]  ;;  %v3865_v50 = vld [vmem:[%s4629_s8 + $0x28] sm:$0xff]  ;;  %v3886_v63 = vld [vmem:[%s4624_s30 + $0x30] sm:$0xff] }
  0x15   : > { %v4355_v14 = vpack.c.bf16 %v4648_v11, %v4645_v10  ;;  %v4363_v15 = vpack.c.bf16 %v4654_v13, %v4651_v12  ;;  %v611_v16 = vmul.f32 %v4645_v10, %v4645_v10  ;;  %v769_v20 = vmul.f32 %v4651_v12, %v4651_v12  ;;  %v3887_v1 = vld [vmem:[%s4624_s30 + $0x38] sm:$0xff]  ;;  %v3888_v6 = vld [vmem:[%s4629_s8 + $0x30] sm:$0xff] }
  0x16   : > { %v770_v21 = vmul.f32 %v4654_v13, %v4654_v13  ;;  %v927_v23 = vmul.f32 %v4651_v12, %v4645_v10  ;;  %v928_v24 = vmul.f32 %v4654_v13, %v4648_v11  ;;  %v4395_v32 = vpack.c.bf16 %v4691_v29, %v4688_v28  ;;  %v3889_v9 = vld [vmem:[%s4629_s8 + $0x38] sm:$0xff] }
  0x17   : > { %4356 = vmatprep.subr.bf16.mxu0 %v4355_v14  ;;  %v4371_v19 = vpack.c.bf16 %v612_v17, %v611_v16  ;;  %v4403_v35 = vpack.c.bf16 %v4705_v34, %v4702_v33  ;;  %v1475_v36 = vmul.f32 %v4688_v28, %v4688_v28  ;;  %v1633_v39 = vmul.f32 %v4702_v33, %v4702_v33 }
  0x18   : > { %4358 = vmatpush3.bf16.msra.mxu0 %v4355_v14  ;;  %v4379_v22 = vpack.c.bf16 %v770_v21, %v769_v20  ;;  %v4387_v27 = vpack.c.bf16 %v928_v24, %v927_v23  ;;  %v1634_v40 = vmul.f32 %v4705_v34, %v4705_v34  ;;  %v1791_v42 = vmul.f32 %v4702_v33, %v4688_v28 }
  0x19   : > { %4364 = vmatprep.subr.bf16.mxu0 %v4363_v15  ;;  %v4411_v38 = vpack.c.bf16 %v1476_v37, %v1475_v36  ;;  %v1792_v43 = vmul.f32 %v4705_v34, %v4691_v29  ;;  %v4740_v47 = vmul.f32 %v3862_v44, %v4639_v7  ;;  %v4743_v48 = vmul.f32 %v3863_v45, %v4641_v8 }
  0x1a   : > { %v4419_v41 = vpack.c.bf16 %v1634_v40, %v1633_v39  ;;  %v4754_v52 = vmul.f32 %v3864_v49, %v4639_v7  ;;  %v4757_v53 = vmul.f32 %v3865_v50, %v4641_v8  ;;  %v4792_v4 = vmul.f32 %v3886_v63, %v4639_v7 }
  0x1b   : > { %4080 = vmatmul.mubr.msk.f32.vlgmr.msra.gmra.mrb[0].mxu0 %vm279_vm0, %v4667_v18  ;;  %v4427_v46 = vpack.c.bf16 %v1792_v43, %v1791_v42  ;;  %v4435_v51 = vpack.c.bf16 %v4743_v48, %v4740_v47  ;;  %v2339_v55 = vmul.f32 %v4740_v47, %v4740_v47  ;;  %v2340_v56 = vmul.f32 %v4743_v48, %v4743_v48 }
  0x1c   : > { %4366 = vmatpush3.bf16.msra.mxu0 %v4363_v15  ;;  %4093 = vmatprep.mubr.msk.f32.mxu0 %vm279_vm0, %v4604_v0  ;;  %v4443_v54 = vpack.c.bf16 %v4757_v53, %v4754_v52  ;;  %v2497_v58 = vmul.f32 %v4754_v52, %v4754_v52  ;;  %v2498_v59 = vmul.f32 %v4757_v53, %v4757_v53 }
  0x1d   : > { %4372 = vmatprep.subr.bf16.mxu0 %v4371_v19  ;;  %v4451_v57 = vpack.c.bf16 %v2340_v56, %v2339_v55  ;;  %v2655_v61 = vmul.f32 %v4754_v52, %v4740_v47  ;;  %v2656_v62 = vmul.f32 %v4757_v53, %v4743_v48  ;;  %v4795_v5 = vmul.f32 %v3887_v1, %v4641_v8 }
  0x1e   : > { %v4459_v60 = vpack.c.bf16 %v2498_v59, %v2497_v58  ;;  %v4806_v15 = vmul.f32 %v3888_v6, %v4639_v7  ;;  %v4809_v16 = vmul.f32 %v3889_v9, %v4641_v8 }
  0x1f   : > { %4094 = vmatmul.mubr.msk.f32.vlgmr.msra.gmra.mrb[2].mxu0 %vm279_vm0, %v4667_v18  ;;  %v4467_v2 = vpack.c.bf16 %v2656_v62, %v2655_v61  ;;  %v4475_v14 = vpack.c.bf16 %v4795_v5, %v4792_v4  ;;  %v3204_v7 = vmul.f32 %v4795_v5, %v4795_v5 }
  0x20   : > { %4374 = vmatpush3.bf16.msra.mxu0 %v4371_v19  ;;  %4107 = vmatprep.mubr.msk.f32.mxu0 %vm279_vm0, %v4604_v0  ;;  %v4483_v17 = vpack.c.bf16 %v4809_v16, %v4806_v15  ;;  %v3203_v19 = vmul.f32 %v4792_v4, %v4792_v4  ;;  %v3361_v20 = vmul.f32 %v4806_v15, %v4806_v15 }
  0x21   : > { %4380 = vmatprep.subr.bf16.mxu0 %v4379_v22  ;;  %v3362_v21 = vmul.f32 %v4809_v16, %v4809_v16  ;;  %v3519_v23 = vmul.f32 %v4806_v15, %v4792_v4  ;;  %v3520_v24 = vmul.f32 %v4809_v16, %v4795_v5 }
  0x22   : > { %v4491_v8 = vpack.c.bf16 %v3204_v7, %v3203_v19 }
  0x23   : > { %4108 = vmatmul.mubr.msk.f32.vlgmr.msra.gmra.mrb[4].mxu0 %vm279_vm0, %v4667_v18  ;;  %v4507_v25 = vpack.c.bf16 %v3520_v24, %v3519_v23 }
  0x24   : > { %4382 = vmatpush3.bf16.msra.mxu0 %v4379_v22  ;;  %4121 = vmatprep.mubr.msk.f32.mxu0 %vm279_vm0, %v4604_v0  ;;  %v4499_v22 = vpack.c.bf16 %v3362_v21, %v3361_v20  ;;  %v276_v20 = vsub.f32 %v4648_v11, %v4654_v13  ;;  %v1146_v13 = vsub.f32 %v4688_v28, %v4702_v33 }
  0x25   : > { %4388 = vmatprep.subr.bf16.mxu0 %v4387_v27 }
  0x27   : > { %4122 = vmatmul.mubr.msk.f32.vlgmr.msra.gmra.mrb[6].mxu0 %vm279_vm0, %v4667_v18 }
  0x28   : > { %4390 = vmatpush3.bf16.msra.mxu0 %v4387_v27  ;;  %4135 = vmatprep.mubr.msk.f32.mxu0 %vm279_vm0, %v4604_v0 }
  0x29   : > { %4396 = vmatprep.subr.bf16.mxu0 %v4395_v32 }
  0x2b   : > { %4136 = vmatmul.mubr.msk.f32.vlgmr.msra.gmra.mrb[8].mxu0 %vm279_vm0, %v4667_v18 }
  0x2c   : > { %4398 = vmatpush3.bf16.msra.mxu0 %v4395_v32  ;;  %4149 = vmatprep.mubr.msk.f32.mxu0 %vm279_vm0, %v4604_v0 }
  0x2d   : > { %4404 = vmatprep.subr.bf16.mxu0 %v4403_v35 }
  0x2f   : > { %4150 = vmatmul.mubr.msk.f32.vlgmr.msra.gmra.mrb[10].mxu0 %vm279_vm0, %v4667_v18 }
  0x30   : > { %4406 = vmatpush3.bf16.msra.mxu0 %v4403_v35  ;;  %4163 = vmatprep.mubr.msk.f32.mxu0 %vm279_vm0, %v4604_v0 }
  0x31   : > { %4412 = vmatprep.subr.bf16.mxu0 %v4411_v38 }
  0x33   : > { %4164 = vmatmul.mubr.msk.f32.vlgmr.msra.gmra.mrb[12].mxu0 %vm279_vm0, %v4667_v18 }
  0x34   : > { %4414 = vmatpush3.bf16.msra.mxu0 %v4411_v38  ;;  %4177 = vmatprep.mubr.msk.f32.mxu0 %vm279_vm0, %v4604_v0 }
  0x35   : > { %4420 = vmatprep.subr.bf16.mxu0 %v4419_v41 }
  0x37   : > { %4178 = vmatmul.mubr.msk.f32.vlgmr.msra.gmra.mrb[14].mxu0 %vm279_vm0, %v4667_v18 }
  0x38   : > { %4422 = vmatpush3.bf16.msra.mxu0 %v4419_v41  ;;  %4191 = vmatprep.mubr.msk.f32.mxu0 %vm279_vm0, %v4604_v0 }
  0x39   : > { %4428 = vmatprep.subr.bf16.mxu0 %v4427_v46 }
  0x3b   : > { %4192 = vmatmul.mubr.msk.f32.vlgmr.msra.gmra.mrb[16].mxu0 %vm279_vm0, %v4667_v18 }
  0x3c   : > { %4430 = vmatpush3.bf16.msra.mxu0 %v4427_v46  ;;  %4205 = vmatprep.mubr.msk.f32.mxu0 %vm279_vm0, %v4604_v0 }
  0x3d   : > { %4436 = vmatprep.subr.bf16.mxu0 %v4435_v51 }
  0x3f   : > { %4206 = vmatmul.mubr.msk.f32.vlgmr.msra.gmra.mrb[18].mxu0 %vm279_vm0, %v4667_v18 }
  0x40   : > { %4438 = vmatpush3.bf16.msra.mxu0 %v4435_v51  ;;  %4219 = vmatprep.mubr.msk.f32.mxu0 %vm279_vm0, %v4604_v0 }
  0x41   : > { %4444 = vmatprep.subr.bf16.mxu0 %v4443_v54 }
  0x43   : > { %4220 = vmatmul.mubr.msk.f32.vlgmr.msra.gmra.mrb[20].mxu0 %vm279_vm0, %v4667_v18 }
  0x44   : > { %4446 = vmatpush3.bf16.msra.mxu0 %v4443_v54  ;;  %4233 = vmatprep.mubr.msk.f32.mxu0 %vm279_vm0, %v4604_v0 }
  0x45   : > { %4452 = vmatprep.subr.bf16.mxu0 %v4451_v57 }
  0x47   : > { %4234 = vmatmul.mubr.msk.f32.vlgmr.msra.gmra.mrb[22].mxu0 %vm279_vm0, %v4667_v18 }
  0x48   : > { %4454 = vmatpush3.bf16.msra.mxu0 %v4451_v57  ;;  %4247 = vmatprep.mubr.msk.f32.mxu0 %vm279_vm0, %v4604_v0 }
  0x49   : > { %4460 = vmatprep.subr.bf16.mxu0 %v4459_v60 }
  0x4b   : > { %4248 = vmatmul.mubr.msk.f32.vlgmr.msra.gmra.mrb[24].mxu0 %vm279_vm0, %v4667_v18 }
  0x4c   : > { %4462 = vmatpush3.bf16.msra.mxu0 %v4459_v60  ;;  %4261 = vmatprep.mubr.msk.f32.mxu0 %vm279_vm0, %v4604_v0 }
  0x4d   : > { %4468 = vmatprep.subr.bf16.mxu0 %v4467_v2 }
  0x4f   : > { %4262 = vmatmul.mubr.msk.f32.vlgmr.msra.gmra.mrb[26].mxu0 %vm279_vm0, %v4667_v18 }
  0x50   : > { %4470 = vmatpush3.bf16.msra.mxu0 %v4467_v2  ;;  %4275 = vmatprep.mubr.msk.f32.mxu0 %vm279_vm0, %v4604_v0 }
  0x51   : > { %4476 = vmatprep.subr.bf16.mxu0 %v4475_v14 }
  0x53   : > { %4276 = vmatmul.mubr.msk.f32.vlgmr.msra.gmra.mrb[28].mxu0 %vm279_vm0, %v4667_v18 }
  0x54   : > { %4478 = vmatpush3.bf16.msra.mxu0 %v4475_v14  ;;  %4289 = vmatprep.mubr.msk.f32.mxu0 %vm279_vm0, %v4604_v0 }
  0x55   : > { %4484 = vmatprep.subr.bf16.mxu0 %v4483_v17 }
  0x57   : > { %4290 = vmatmul.mubr.msk.f32.vlgmr.msra.gmra.mrb[30].mxu0 %vm279_vm0, %v4667_v18 }
  0x58   : > { %4486 = vmatpush3.bf16.msra.mxu0 %v4483_v17  ;;  %4303 = vmatprep.mubr.msk.f32.mxu0 %vm279_vm0, %v4604_v0 }
  0x59   : > { %4492 = vmatprep.subr.bf16.mxu0 %v4491_v8 }
  0x5b   : > { %4304 = vmatmul.mubr.msk.f32.vlgmr.msra.gmra.mrb[32].mxu0 %vm279_vm0, %v4667_v18 }
  0x5c   : > { %4494 = vmatpush3.bf16.msra.mxu0 %v4491_v8  ;;  %4317 = vmatprep.mubr.msk.f32.mxu0 %vm279_vm0, %v4604_v0  ;;  %v275_v8 = vsub.f32 %v4645_v10, %v4651_v12 }
  0x5d   : > { %4500 = vmatprep.subr.bf16.mxu0 %v4499_v22 }
  0x5e   : > { %v277_v21 = vand.u32 2147483647, %v275_v8 }
  0x5f   : > { %4318 = vmatmul.mubr.msk.f32.vlgmr.msra.gmra.mrb[34].mxu0 %vm279_vm0, %v4667_v18 }
  0x60   : > { %4502 = vmatpush3.bf16.msra.mxu0 %v4499_v22  ;;  %4331 = vmatprep.mubr.msk.f32.mxu0 %vm279_vm0, %v4604_v0  ;;  %v278_v22 = vand.u32 2147483647, %v276_v20  ;;  %v280_v23 = vsel %vm279_vm0, %v277_v21, 0.0 }
  0x61   : > { %4508 = vmatprep.subr.bf16.mxu0 %v4507_v25 }
  0x62   : > { %v281_v24 = vsel %vm279_vm0, %v278_v22, 0.0 }
  0x63   : > { %4332 = vmatmul.mubr.msk.f32.vlgmr.msra.gmra.mrb[36].mxu0 %vm279_vm0, %v4667_v18 }
  0x64   : > { %4510 = vmatpush3.bf16.msra.mxu0 %v4507_v25  ;;  %4345 = vmatprep.mubr.msk.f32.mxu0 %vm279_vm0, %v4604_v0  ;;  %v2011_v25 = vsub.f32 %v4743_v48, %v4757_v53 }
  0x67   : > { %4346 = vmatmul.mubr.msk.f32.vlgmr.msra.gmra.mrb[38].mxu0 %vm279_vm0, %v4667_v18 }
  0xee   : > { %v4081_v26 = vpop.f32.mrb[0].mxu0 }
  0xef   : > { %v365_v27 = vpop.f32.mrb[1].mxu0 }
  0xf0   : > { %4086 = vmatprep.mubr.msk.f32.mxu1 %vm279_vm0, %v365_v27 }
  0xf1   : > { %4087 = vmatmul.mubr.msk.f32.vlgmr.msra.gmra.mrb[0].mxu1 %vm279_vm0, %v4081_v26  ;;  %v282_v26 = vadd.f32 %v281_v24, %v280_v23 }
  0xf2   : > { %v4095_v30 = vpop.f32.mrb[2].mxu0  ;;  %4370 = vmatpush3.bf16.msra.mxu1 %v4616_v3 }
  0xf3   : > { %v521_v31 = vpop.f32.mrb[3].mxu0  ;;  %4376 = vmatprep.subr.bf16.mxu1 %v4616_v3  ;;  %283 = vadd.xlane.f32.xlu0 %v282_v26 }
  0xf4   : > { %4100 = vmatprep.mubr.msk.f32.mxu1 %vm279_vm0, %v521_v31  ;;  %v1147_v31 = vsub.f32 %v4691_v29, %v4705_v34 }
  0xf5   : > { %4101 = vmatmul.mubr.msk.f32.vlgmr.msra.gmra.mrb[2].mxu1 %vm279_vm0, %v4095_v30  ;;  %v2013_v30 = vand.u32 2147483647, %v2011_v25 }
  0xf6   : > { %v4109_v0 = vpop.f32.mrb[4].mxu0  ;;  %4378 = vmatpush3.bf16.msra.mxu1 %v4616_v3 }
  0xf7   : > { %v679_v18 = vpop.f32.mrb[5].mxu0  ;;  %4384 = vmatprep.subr.bf16.mxu1 %v4616_v3  ;;  %v2015_v11 = vsel %vm279_vm0, %v2013_v30, 0.0 }
  0xf8   : > { %4114 = vmatprep.mubr.msk.f32.mxu1 %vm279_vm0, %v679_v18 }
  0xf9   : > { %4115 = vmatmul.mubr.msk.f32.vlgmr.msra.gmra.mrb[4].mxu1 %vm279_vm0, %v4109_v0 }
  0xfa   : > { %v4123_v32 = vpop.f32.mrb[6].mxu0  ;;  %4386 = vmatpush3.bf16.msra.mxu1 %v4616_v3 }
  0xfb   : > { %v837_v35 = vpop.f32.mrb[7].mxu0  ;;  %4392 = vmatprep.subr.bf16.mxu1 %v4616_v3 }
  0xfc   : > { %4128 = vmatprep.mubr.msk.f32.mxu1 %vm279_vm0, %v837_v35 }
  0xfd   : > { %4129 = vmatmul.mubr.msk.f32.vlgmr.msra.gmra.mrb[6].mxu1 %vm279_vm0, %v4123_v32 }
  0xfe   : > { %v4137_v36 = vpop.f32.mrb[8].mxu0  ;;  %4394 = vmatpush3.bf16.msra.mxu1 %v4616_v3 }
  0xff   : > { %v995_v37 = vpop.f32.mrb[9].mxu0  ;;  %4400 = vmatprep.subr.bf16.mxu1 %v4616_v3 }
 0x100   : > { %4142 = vmatprep.mubr.msk.f32.mxu1 %vm279_vm0, %v995_v37 }
 0x101   : > { %4143 = vmatmul.mubr.msk.f32.vlgmr.msra.gmra.mrb[8].mxu1 %vm279_vm0, %v4137_v36 }
 0x102   : > { %v4151_v38 = vpop.f32.mrb[10].mxu0  ;;  %4402 = vmatpush3.bf16.msra.mxu1 %v4616_v3 }
 0x103   : > { %v1229_v39 = vpop.f32.mrb[11].mxu0  ;;  %4408 = vmatprep.subr.bf16.mxu1 %v4616_v3 }
 0x104   : > { %4156 = vmatprep.mubr.msk.f32.mxu1 %vm279_vm0, %v1229_v39 }
 0x105   : > { %4157 = vmatmul.mubr.msk.f32.vlgmr.msra.gmra.mrb[10].mxu1 %vm279_vm0, %v4151_v38 }
 0x106   : > { %v4165_v40 = vpop.f32.mrb[12].mxu0  ;;  %4410 = vmatpush3.bf16.msra.mxu1 %v4616_v3 }
 0x107   : > { %v1385_v41 = vpop.f32.mrb[13].mxu0  ;;  %4416 = vmatprep.subr.bf16.mxu1 %v4616_v3 }
 0x108   : > { %4170 = vmatprep.mubr.msk.f32.mxu1 %vm279_vm0, %v1385_v41 }
 0x109   : > { %4171 = vmatmul.mubr.msk.f32.vlgmr.msra.gmra.mrb[12].mxu1 %vm279_vm0, %v4165_v40 }
 0x10a   : > { %v4179_v42 = vpop.f32.mrb[14].mxu0  ;;  %4418 = vmatpush3.bf16.msra.mxu1 %v4616_v3 }
 0x10b   : > { %v1543_v43 = vpop.f32.mrb[15].mxu0  ;;  %4424 = vmatprep.subr.bf16.mxu1 %v4616_v3 }
 0x10c   : > { %4184 = vmatprep.mubr.msk.f32.mxu1 %vm279_vm0, %v1543_v43 }
 0x10d   : > { %4185 = vmatmul.mubr.msk.f32.vlgmr.msra.gmra.mrb[14].mxu1 %vm279_vm0, %v4179_v42 }
 0x10e   : > { %v4193_v44 = vpop.f32.mrb[16].mxu0  ;;  %4426 = vmatpush3.bf16.msra.mxu1 %v4616_v3 }
 0x10f   : > { %v1701_v45 = vpop.f32.mrb[17].mxu0  ;;  %4432 = vmatprep.subr.bf16.mxu1 %v4616_v3 }
 0x110   : > { %4198 = vmatprep.mubr.msk.f32.mxu1 %vm279_vm0, %v1701_v45 }
 0x111   : > { %4199 = vmatmul.mubr.msk.f32.vlgmr.msra.gmra.mrb[16].mxu1 %vm279_vm0, %v4193_v44 }
 0x112   : > { %v4207_v46 = vpop.f32.mrb[18].mxu0  ;;  %4434 = vmatpush3.bf16.msra.mxu1 %v4616_v3 }
 0x113   : > { %v1859_v49 = vpop.f32.mrb[19].mxu0  ;;  %4440 = vmatprep.subr.bf16.mxu1 %v4616_v3 }
 0x114   : > { %4212 = vmatprep.mubr.msk.f32.mxu1 %vm279_vm0, %v1859_v49 }
 0x115   : > { %4213 = vmatmul.mubr.msk.f32.vlgmr.msra.gmra.mrb[18].mxu1 %vm279_vm0, %v4207_v46 }
 0x116   : > { %v4221_v50 = vpop.f32.mrb[20].mxu0  ;;  %4442 = vmatpush3.bf16.msra.mxu1 %v4616_v3 }
 0x117   : > { %v2093_v51 = vpop.f32.mrb[21].mxu0  ;;  %4448 = vmatprep.subr.bf16.mxu1 %v4616_v3 }
 0x118   : > { %4226 = vmatprep.mubr.msk.f32.mxu1 %vm279_vm0, %v2093_v51 }
 0x119   : > { %4227 = vmatmul.mubr.msk.f32.vlgmr.msra.gmra.mrb[20].mxu1 %vm279_vm0, %v4221_v50 }
 0x11a   : > { %v4235_v54 = vpop.f32.mrb[22].mxu0  ;;  %4450 = vmatpush3.bf16.msra.mxu1 %v4616_v3 }
 0x11b   : > { %v2249_v55 = vpop.f32.mrb[23].mxu0  ;;  %4456 = vmatprep.subr.bf16.mxu1 %v4616_v3 }
 0x11c   : > { %4240 = vmatprep.mubr.msk.f32.mxu1 %vm279_vm0, %v2249_v55 }
 0x11d   : > { %4241 = vmatmul.mubr.msk.f32.vlgmr.msra.gmra.mrb[22].mxu1 %vm279_vm0, %v4235_v54 }
 0x11e   : > { %v4249_v56 = vpop.f32.mrb[24].mxu0  ;;  %4458 = vmatpush3.bf16.msra.mxu1 %v4616_v3 }
 0x11f   : > { %v2407_v57 = vpop.f32.mrb[25].mxu0  ;;  %4464 = vmatprep.subr.bf16.mxu1 %v4616_v3 }
 0x120   : > { %4254 = vmatprep.mubr.msk.f32.mxu1 %vm279_vm0, %v2407_v57 }
 0x121   : > { %4255 = vmatmul.mubr.msk.f32.vlgmr.msra.gmra.mrb[24].mxu1 %vm279_vm0, %v4249_v56 }
 0x122   : > { %v4263_v58 = vpop.f32.mrb[26].mxu0  ;;  %4466 = vmatpush3.bf16.msra.mxu1 %v4616_v3 }
 0x123   : > { %v2565_v59 = vpop.f32.mrb[27].mxu0  ;;  %4472 = vmatprep.subr.bf16.mxu1 %v4616_v3 }
 0x124   : > { %4268 = vmatprep.mubr.msk.f32.mxu1 %vm279_vm0, %v2565_v59 }
 0x125   : > { %4269 = vmatmul.mubr.msk.f32.vlgmr.msra.gmra.mrb[26].mxu1 %vm279_vm0, %v4263_v58 }
 0x126   : > { %v4277_v60 = vpop.f32.mrb[28].mxu0  ;;  %4474 = vmatpush3.bf16.msra.mxu1 %v4616_v3 }
 0x127   : > { %v2723_v61 = vpop.f32.mrb[29].mxu0  ;;  %4480 = vmatprep.subr.bf16.mxu1 %v4616_v3 }
 0x128   : > { %4282 = vmatprep.mubr.msk.f32.mxu1 %vm279_vm0, %v2723_v61 }
 0x129   : > { %4283 = vmatmul.mubr.msk.f32.vlgmr.msra.gmra.mrb[28].mxu1 %vm279_vm0, %v4277_v60 }
 0x12a   : > { %v4291_v62 = vpop.f32.mrb[30].mxu0  ;;  %4482 = vmatpush3.bf16.msra.mxu1 %v4616_v3 }
 0x12b   : > { %v2957_v63 = vpop.f32.mrb[31].mxu0  ;;  %4488 = vmatprep.subr.bf16.mxu1 %v4616_v3 }
 0x12c   : > { %4296 = vmatprep.mubr.msk.f32.mxu1 %vm279_vm0, %v2957_v63 }
 0x12d   : > { %4297 = vmatmul.mubr.msk.f32.vlgmr.msra.gmra.mrb[30].mxu1 %vm279_vm0, %v4291_v62 }
 0x12e   : > { %v4305_v1 = vpop.f32.mrb[32].mxu0  ;;  %4490 = vmatpush3.bf16.msra.mxu1 %v4616_v3 }
 0x12f   : > { %v3113_v2 = vpop.f32.mrb[33].mxu0  ;;  %4496 = vmatprep.subr.bf16.mxu1 %v4616_v3 }
 0x130   : > { %4310 = vmatprep.mubr.msk.f32.mxu1 %vm279_vm0, %v3113_v2 }
 0x131   : > { %4311 = vmatmul.mubr.msk.f32.vlgmr.msra.gmra.mrb[32].mxu1 %vm279_vm0, %v4305_v1 }
 0x132   : > { %v4319_v6 = vpop.f32.mrb[34].mxu0  ;;  %4498 = vmatpush3.bf16.msra.mxu1 %v4616_v3 }
 0x133   : > { %v3271_v9 = vpop.f32.mrb[35].mxu0  ;;  %4504 = vmatprep.subr.bf16.mxu1 %v4616_v3 }
 0x134   : > { %4324 = vmatprep.mubr.msk.f32.mxu1 %vm279_vm0, %v3271_v9 }
 0x135   : > { %4325 = vmatmul.mubr.msk.f32.vlgmr.msra.gmra.mrb[34].mxu1 %vm279_vm0, %v4319_v6 }
 0x136   : > { %v4333_v14 = vpop.f32.mrb[36].mxu0  ;;  %4506 = vmatpush3.bf16.msra.mxu1 %v4616_v3 }
 0x137   : > { %v3429_v17 = vpop.f32.mrb[37].mxu0  ;;  %4512 = vmatprep.subr.bf16.mxu1 %v4616_v3 }
 0x138   : > { %4338 = vmatprep.mubr.msk.f32.mxu1 %vm279_vm0, %v3429_v17 }
 0x139   : > { %4339 = vmatmul.mubr.msk.f32.vlgmr.msra.gmra.mrb[36].mxu1 %vm279_vm0, %v4333_v14 }
 0x13a   : > { %v4347_v19 = vpop.f32.mrb[38].mxu0  ;;  %4514 = vmatpush3.bf16.msra.mxu1 %v4616_v3  ;;  %v2010_v3 = vsub.f32 %v4740_v47, %v4754_v52  ;;  %v1148_v47 = vand.u32 2147483647, %v1146_v13  ;;  %v1149_v52 = vand.u32 2147483647, %v1147_v31 }
 0x13b   : > { %v3587_v7 = vpop.f32.mrb[39].mxu0 }
 0x13c   : > { %4352 = vmatprep.mubr.msk.f32.mxu1 %vm279_vm0, %v3587_v7  ;;  %v2012_v27 = vand.u32 2147483647, %v2010_v3  ;;  %v1150_v48 = vsel %vm279_vm0, %v1148_v47, 0.0  ;;  %v1151_v53 = vsel %vm279_vm0, %v1149_v52, 0.0  ;;  %v2874_v47 = vsub.f32 %v4792_v4, %v4806_v15 }
 0x13d   : > { %4353 = vmatmul.mubr.msk.f32.vlgmr.msra.gmra.mrb[38].mxu1 %vm279_vm0, %v4347_v19  ;;  %v1152_v0 = vadd.f32 %v1151_v53, %v1150_v48  ;;  %v2875_v52 = vsub.f32 %v4795_v5, %v4809_v16 }
 0x13e   : > { %v2014_v10 = vsel %vm279_vm0, %v2012_v27, 0.0 }
 0x13f   : > { %v2016_v12 = vadd.f32 %v2015_v11, %v2014_v10  ;;  %1153 = vadd.xlane.f32.xlu1 %v1152_v0 }
 0x141   : > { %2017 = vadd.xlane.f32.xlu0 %v2016_v12 }
 0x1c4   : > { %v4088_v18 = vpop.f32.mrb[0].mxu1 }
 0x1c5   : > { %v446_v32 = vpop.f32.mrb[1].mxu1  ;;  %v1086_v36 = vmul.f32 %v4088_v18, %v4088_v18 }
 0x1c6   : > { %v1085_v40 = vmul.f32 %v446_v32, %v446_v32 }
 0x1c8   : > { %v4102_v35 = vpop.f32.mrb[2].mxu1 }
 0x1c9   : > { %v1088_v37 = vmul.f32 %v4102_v35, %v4102_v35  ;;  %v1090_v38 = vmul.f32 %v4102_v35, %v4088_v18  ;;  %v602_v39 = vpop.f32.mrb[3].mxu1  ;;  %v2876_v35 = vand.u32 2147483647, %v2874_v47 }
 0x1ca   : > { %v1087_v28 = vmul.f32 %v602_v39, %v602_v39  ;;  %v1089_v33 = vmul.f32 %v602_v39, %v446_v32 }
 0x1cb   : > { %v1108_v41 = vadd.f32 %v1088_v37, %v1086_v36  ;;  %v1098_v54 = vmul.f32 2.0, %v1090_v38  ;;  %v2878_v4 = vsel %vm279_vm0, %v2876_v35, 0.0 }
 0x1cc   : > { %v1107_v29 = vadd.f32 %v1087_v28, %v1085_v40  ;;  %v4116_v34 = vpop.f32.mrb[4].mxu1  ;;  %v1097_v61 = vmul.f32 2.0, %v1089_v33 }
 0x1cd   : > { %v1092_v42 = vsub.f32 %v4116_v34, %v1086_v36  ;;  %v760_v43 = vpop.f32.mrb[5].mxu1  ;;  %v1110_v57 = vadd.f32 0.0001, %v1108_v41  ;;  %v1100_v9 = vadd.f32 0.0001, %v1098_v54 }
 0x1ce   : > { %v1091_v44 = vsub.f32 %v760_v43, %v1085_v40  ;;  %v1109_v62 = vadd.f32 0.0001, %v1107_v29  ;;  %v1099_v21 = vadd.f32 0.0001, %v1097_v61  ;;  %v2877_v36 = vand.u32 2147483647, %v2875_v52 }
 0x1d0   : > { %v4130_v45 = vpop.f32.mrb[6].mxu1  ;;  %v2879_v5 = vsel %vm279_vm0, %v2877_v36, 0.0 }
 0x1d1   : > { %v1094_v46 = vsub.f32 %v4130_v45, %v1088_v37  ;;  %v918_v49 = vpop.f32.mrb[7].mxu1 }
 0x1d2   : > { %v1093_v50 = vsub.f32 %v918_v49, %v1087_v28 }
 0x1d3   : > { %v1112_v51 = vadd.f32 %v1094_v46, %v1092_v42 }
 0x1d4   : > { %v1111_v55 = vadd.f32 %v1093_v50, %v1091_v44  ;;  %v4144_v56 = vpop.f32.mrb[8].mxu1 }
 0x1d5   : > { %v1114_v58 = vadd.f32 0.0009, %v1112_v51  ;;  %v1096_v59 = vsub.f32 %v4144_v56, %v1090_v38  ;;  %v1076_v60 = vpop.f32.mrb[9].mxu1 }
 0x1d6   : > { %v1113_v63 = vadd.f32 0.0009, %v1111_v55  ;;  %v1095_v1 = vsub.f32 %v1076_v60, %v1089_v33 }
 0x1d7   : > { %v1116_v2 = vmul.f32 %v1114_v58, %v1110_v57  ;;  %v1102_v6 = vmul.f32 2.0, %v1096_v59 }
 0x1d8   : > { %v1115_v14 = vmul.f32 %v1113_v63, %v1109_v62  ;;  %v1101_v17 = vmul.f32 2.0, %v1095_v1  ;;  %v4158_v19 = vpop.f32.mrb[10].mxu1  ;;  %v2880_v1 = vadd.f32 %v2879_v5, %v2878_v4 }
 0x1d9   : > { %v1118_v7 = vadd.f32 1e-12, %v1116_v2  ;;  %v1104_v8 = vadd.f32 0.0009, %v1102_v6  ;;  %v1310_v20 = vpop.f32.mrb[11].mxu1  ;;  %v1950_v26 = vmul.f32 %v4158_v19, %v4158_v19 }
 0x1da   : > { %v1117_v22 = vadd.f32 1e-12, %v1115_v14  ;;  %v1103_v23 = vadd.f32 0.0009, %v1101_v17  ;;  %v1949_v11 = vmul.f32 %v1310_v20, %v1310_v20 }
 0x1db   : > { %4539 = vrcp.f32 %v1118_v7  ;;  %v1106_v24 = vmul.f32 %v1104_v8, %v1100_v9 }
 0x1dc   : > { %4541 = vrcp.f32 %v1117_v22  ;;  %v1105_v3 = vmul.f32 %v1103_v23, %v1099_v21  ;;  %v4172_v25 = vpop.f32.mrb[12].mxu1 }
 0x1dd   : > { %v1952_v27 = vmul.f32 %v4172_v25, %v4172_v25  ;;  %v1954_v30 = vmul.f32 %v4172_v25, %v4158_v19  ;;  %v1466_v10 = vpop.f32.mrb[13].mxu1 }
 0x1de   : > { %v1951_v12 = vmul.f32 %v1466_v10, %v1466_v10  ;;  %v1953_v13 = vmul.f32 %v1466_v10, %v1310_v20 }
 0x1df   : > { %v1972_v31 = vadd.f32 %v1952_v27, %v1950_v26  ;;  %v1962_v15 = vmul.f32 2.0, %v1954_v30 }
 0x1e0   : > { %v1971_v48 = vadd.f32 %v1951_v12, %v1949_v11  ;;  %v4186_v53 = vpop.f32.mrb[14].mxu1  ;;  %v1961_v16 = vmul.f32 2.0, %v1953_v13 }
 0x1e1   : > { %v1956_v0 = vsub.f32 %v4186_v53, %v1950_v26  ;;  %v1624_v18 = vpop.f32.mrb[15].mxu1  ;;  %v1974_v45 = vadd.f32 0.0001, %v1972_v31  ;;  %v1964_v60 = vadd.f32 0.0001, %v1962_v15 }
 0x1e2   : > { %v1955_v32 = vsub.f32 %v1624_v18, %v1949_v11  ;;  %v1973_v54 = vadd.f32 0.0001, %v1971_v48  ;;  %v1963_v14 = vadd.f32 0.0001, %v1961_v16 }
 0x1e4   : > { %v4200_v37 = vpop.f32.mrb[16].mxu1 }
 0x1e5   : > { %v4540_v38 = vpop.eup %4539  ;;  %v1958_v39 = vsub.f32 %v4200_v37, %v1952_v27  ;;  %v1782_v40 = vpop.f32.mrb[17].mxu1 }
 0x1e6   : > { %v4542_v28 = vpop.eup %4541  ;;  %v1957_v33 = vsub.f32 %v1782_v40, %v1951_v12  ;;  %v1122_v41 = vmul.f32 %v4540_v38, %v1106_v24 }
 0x1e7   : > { %v1976_v29 = vadd.f32 %v1958_v39, %v1956_v0  ;;  %v1120_v34 = vmul.f32 %v4542_v28, %v1105_v3  ;;  %v284_v3 = vpop.xlane.xlu0 %283 }
 0x1e8   : > { %v1975_v42 = vadd.f32 %v1957_v33, %v1955_v32  ;;  %v4214_v43 = vpop.f32.mrb[18].mxu1  ;;  %v1124_v44 = vsel %vm279_vm0, %v1122_v41, 0.0 }
 0x1e9   : > { %v1978_v46 = vadd.f32 0.0009, %v1976_v29  ;;  %v1960_v49 = vsub.f32 %v4214_v43, %v1954_v30  ;;  %v1940_v50 = vpop.f32.mrb[19].mxu1  ;;  %v1123_v51 = vsel %vm279_vm0, %v1120_v34, 0.0  ;;  %v285_v30 = vrot.slane %v284_v3, 4 }
 0x1ea   : > { %v1977_v55 = vadd.f32 0.0009, %v1975_v42  ;;  %v1959_v56 = vsub.f32 %v1940_v50, %v1953_v13  ;;  %v1125_v57 = vadd.f32 %v1124_v44, %v1123_v51 }
 0x1eb   : > { %v1980_v58 = vmul.f32 %v1978_v46, %v1974_v45  ;;  %v1966_v59 = vmul.f32 2.0, %v1960_v49  ;;  %v286_v52 = vadd.f32 %v285_v30, %v284_v3 }
 0x1ec   : > { %v1979_v61 = vmul.f32 %v1977_v55, %v1973_v54  ;;  %v1965_v62 = vmul.f32 2.0, %v1959_v56  ;;  %v4228_v63 = vpop.f32.mrb[20].mxu1  ;;  %1126 = vadd.xlane.f32.xlu0 %v1125_v57 }
 0x1ed   : > { %v1982_v2 = vadd.f32 1e-12, %v1980_v58  ;;  %v1968_v6 = vadd.f32 0.0009, %v1966_v59  ;;  %v2174_v9 = vpop.f32.mrb[21].mxu1  ;;  %v2814_v21 = vmul.f32 %v4228_v63, %v4228_v63  ;;  %v287_v37 = vrot.slane %v286_v52, 2 }
 0x1ee   : > { %v1981_v17 = vadd.f32 1e-12, %v1979_v61  ;;  %v1967_v19 = vadd.f32 0.0009, %v1965_v62  ;;  %v2813_v25 = vmul.f32 %v2174_v9, %v2174_v9 }
 0x1ef   : > { %4543 = vrcp.f32 %v1982_v2  ;;  %v1970_v7 = vmul.f32 %v1968_v6, %v1964_v60  ;;  %v288_v46 = vadd.f32 %v287_v37, %v286_v52 }
 0x1f0   : > { %4545 = vrcp.f32 %v1981_v17  ;;  %v1969_v8 = vmul.f32 %v1967_v19, %v1963_v14  ;;  %v4242_v20 = vpop.f32.mrb[22].mxu1  ;;  %2881 = vadd.xlane.f32.xlu0 %v2880_v1 }
 0x1f1   : > { %v2816_v22 = vmul.f32 %v4242_v20, %v4242_v20  ;;  %v2818_v23 = vmul.f32 %v4242_v20, %v4228_v63  ;;  %v2330_v24 = vpop.f32.mrb[23].mxu1  ;;  %v289_v57 = vrot.slane %v288_v46, 1 }
 0x1f2   : > { %v2815_v26 = vmul.f32 %v2330_v24, %v2330_v24  ;;  %v2817_v27 = vmul.f32 %v2330_v24, %v2174_v9 }
 0x1f3   : > { %v2836_v10 = vadd.f32 %v2816_v22, %v2814_v21  ;;  %v2826_v38 = vmul.f32 2.0, %v2818_v23  ;;  %v290_v1 = vadd.f32 %v289_v57, %v288_v46 }
 0x1f4   : > { %v2835_v11 = vadd.f32 %v2815_v26, %v2813_v25  ;;  %v4256_v12 = vpop.f32.mrb[24].mxu1  ;;  %v2825_v33 = vmul.f32 2.0, %v2817_v27 }
 0x1f5   : > { %v2820_v13 = vsub.f32 %v4256_v12, %v2814_v21  ;;  %v2488_v31 = vpop.f32.mrb[25].mxu1  ;;  %v2838_v28 = vadd.f32 0.0001, %v2836_v10  ;;  %v2828_v51 = vadd.f32 0.0001, %v2826_v38  ;;  %4515 = vpush %v290_v1 }
 0x1f6   : > { %v2819_v47 = vsub.f32 %v2488_v31, %v2813_v25  ;;  %v2837_v4 = vadd.f32 0.0001, %v2835_v11  ;;  %v2827_v61 = vadd.f32 0.0001, %v2825_v33 }
 0x1f8   : > { %v4270_v48 = vpop.f32.mrb[26].mxu1 }
 0x1f9   : > { %v4544_v53 = vpop.eup %4543  ;;  %v2822_v0 = vsub.f32 %v4270_v48, %v2816_v22  ;;  %v2646_v18 = vpop.f32.mrb[27].mxu1 }
 0x1fa   : > { %v4546_v32 = vpop.eup %4545  ;;  %v2821_v35 = vsub.f32 %v2646_v18, %v2815_v26  ;;  %v1986_v36 = vmul.f32 %v4544_v53, %v1970_v7 }
 0x1fb   : > { %v2840_v39 = vadd.f32 %v2822_v0, %v2820_v13  ;;  %v1984_v40 = vmul.f32 %v4546_v32, %v1969_v8 }
 0x1fc   : > { %v2839_v41 = vadd.f32 %v2821_v35, %v2819_v47  ;;  %v4284_v29 = vpop.f32.mrb[28].mxu1  ;;  %v1988_v34 = vsel %vm279_vm0, %v1986_v36, 0.0 }
 0x1fd   : > { %v2842_v5 = vadd.f32 0.0009, %v2840_v39  ;;  %v2824_v15 = vsub.f32 %v4284_v29, %v2818_v23  ;;  %v2804_v16 = vpop.f32.mrb[29].mxu1  ;;  %v1987_v42 = vsel %vm279_vm0, %v1984_v40, 0.0 }
 0x1fe   : > { %v2841_v43 = vadd.f32 0.0009, %v2839_v41  ;;  %v2823_v44 = vsub.f32 %v2804_v16, %v2817_v27  ;;  %v1989_v45 = vadd.f32 %v1988_v34, %v1987_v42 }
 0x1ff   : > { %v2844_v49 = vmul.f32 %v2842_v5, %v2838_v28  ;;  %v2830_v50 = vmul.f32 2.0, %v2824_v15 }
 0x200   : > { %v2843_v54 = vmul.f32 %v2841_v43, %v2837_v4  ;;  %v2829_v55 = vmul.f32 2.0, %v2823_v44  ;;  %v4298_v56 = vpop.f32.mrb[30].mxu1  ;;  %1990 = vadd.xlane.f32.xlu1 %v1989_v45 }
 0x201   : > { %v2846_v58 = vadd.f32 1e-12, %v2844_v49  ;;  %v2832_v59 = vadd.f32 0.0009, %v2830_v50  ;;  %v3038_v60 = vpop.f32.mrb[31].mxu1  ;;  %v3678_v14 = vmul.f32 %v4298_v56, %v4298_v56 }
 0x202   : > { %v2845_v62 = vadd.f32 1e-12, %v2843_v54  ;;  %v2831_v63 = vadd.f32 0.0009, %v2829_v55  ;;  %v3677_v8 = vmul.f32 %v3038_v60, %v3038_v60 }
 0x203   : > { %4547 = vrcp.f32 %v2846_v58  ;;  %v2834_v2 = vmul.f32 %v2832_v59, %v2828_v51  ;;  %v1154_v59 = vpop.xlane.xlu1 %1153 }
 0x204   : > { %4549 = vrcp.f32 %v2845_v62  ;;  %v2833_v6 = vmul.f32 %v2831_v63, %v2827_v61  ;;  %v4312_v9 = vpop.f32.mrb[32].mxu1  ;;  %v2018_v61 = vpop.xlane.xlu0 %2017 }
 0x205   : > { %v3680_v17 = vmul.f32 %v4312_v9, %v4312_v9  ;;  %v3682_v19 = vmul.f32 %v4312_v9, %v4298_v56  ;;  %v3194_v7 = vpop.f32.mrb[33].mxu1 }
 0x206   : > { %v3679_v20 = vmul.f32 %v3194_v7, %v3194_v7  ;;  %v3681_v21 = vmul.f32 %v3194_v7, %v3038_v60  ;;  %v1155_v60 = vrot.slane %v1154_v59, 4 }
 0x207   : > { %v3700_v22 = vadd.f32 %v3680_v17, %v3678_v14  ;;  %v3690_v48 = vmul.f32 2.0, %v3682_v19 }
 0x208   : > { %v3699_v23 = vadd.f32 %v3679_v20, %v3677_v8  ;;  %v4326_v24 = vpop.f32.mrb[34].mxu1  ;;  %v3689_v53 = vmul.f32 2.0, %v3681_v21  ;;  %v1156_v62 = vadd.f32 %v1155_v60, %v1154_v59 }
 0x209   : > { %v3684_v3 = vsub.f32 %v4326_v24, %v3678_v14  ;;  %v3352_v25 = vpop.f32.mrb[35].mxu1  ;;  %v3702_v35 = vadd.f32 0.0001, %v3700_v22  ;;  %v3692_v15 = vadd.f32 0.0001, %v3690_v48 }
 0x20a   : > { %v3683_v26 = vsub.f32 %v3352_v25, %v3677_v8  ;;  %v3701_v40 = vadd.f32 0.0001, %v3699_v23  ;;  %v3691_v43 = vadd.f32 0.0001, %v3689_v53  ;;  %v1157_v63 = vrot.slane %v1156_v62, 2 }
 0x20b   : > { %v2019_v8 = vrot.slane %v2018_v61, 4 }
 0x20c   : > { %v4340_v27 = vpop.f32.mrb[36].mxu1 }
 0x20d   : > { %v4548_v30 = vpop.eup %4547  ;;  %v3686_v10 = vsub.f32 %v4340_v27, %v3680_v17  ;;  %v3510_v11 = vpop.f32.mrb[37].mxu1  ;;  %v2020_v22 = vadd.f32 %v2019_v8, %v2018_v61 }
 0x20e   : > { %v4550_v12 = vpop.eup %4549  ;;  %v3685_v13 = vsub.f32 %v3510_v11, %v3679_v20  ;;  %v2850_v31 = vmul.f32 %v4548_v30, %v2834_v2 }
 0x20f   : > { %v3704_v47 = vadd.f32 %v3686_v10, %v3684_v3  ;;  %v2848_v52 = vmul.f32 %v4550_v12, %v2833_v6  ;;  %v1158_v6 = vadd.f32 %v1157_v63, %v1156_v62  ;;  %v2021_v23 = vrot.slane %v2020_v22, 2 }
 0x210   : > { %v3703_v0 = vadd.f32 %v3685_v13, %v3683_v26  ;;  %v4354_v18 = vpop.f32.mrb[38].mxu1  ;;  %v2852_v32 = vsel %vm279_vm0, %v2850_v31, 0.0 }
 0x211   : > { %v3706_v36 = vadd.f32 0.0009, %v3704_v47  ;;  %v3688_v37 = vsub.f32 %v4354_v18, %v3682_v19  ;;  %v3668_v38 = vpop.f32.mrb[39].mxu1  ;;  %v2851_v39 = vsel %vm279_vm0, %v2848_v52, 0.0  ;;  %v1159_v17 = vrot.slane %v1158_v6, 1 }
 0x212   : > { %v3705_v28 = vadd.f32 0.0009, %v3703_v0  ;;  %v3687_v33 = vsub.f32 %v3668_v38, %v3681_v21  ;;  %v2853_v41 = vadd.f32 %v2852_v32, %v2851_v39  ;;  %v2022_v25 = vadd.f32 %v2021_v23, %v2020_v22 }
 0x213   : > { %v3708_v29 = vmul.f32 %v3706_v36, %v3702_v35  ;;  %v3694_v34 = vmul.f32 2.0, %v3688_v37  ;;  %v1160_v20 = vadd.f32 %v1159_v17, %v1158_v6 }
 0x214   : > { %v3707_v4 = vmul.f32 %v3705_v28, %v3701_v40  ;;  %v3693_v5 = vmul.f32 2.0, %v3687_v33  ;;  %2854 = vadd.xlane.f32.xlu1 %v2853_v41  ;;  %v2023_v30 = vrot.slane %v2022_v25, 1 }
 0x215   : > { %v3710_v16 = vadd.f32 1e-12, %v3708_v29  ;;  %v3696_v42 = vadd.f32 0.0009, %v3694_v34 }
 0x216   : > { %v3709_v44 = vadd.f32 1e-12, %v3707_v4  ;;  %v3695_v45 = vadd.f32 0.0009, %v3693_v5  ;;  %v2024_v31 = vadd.f32 %v2023_v30, %v2022_v25 }
 0x217   : > { %4551 = vrcp.f32 %v3710_v16  ;;  %v3698_v46 = vmul.f32 %v3696_v42, %v3692_v15 }
 0x218   : > { %4553 = vrcp.f32 %v3709_v44  ;;  %v3697_v49 = vmul.f32 %v3695_v45, %v3691_v43 }
 0x221   : > { %v4552_v50 = vpop.eup %4551 }
 0x222   : > { %v4554_v51 = vpop.eup %4553  ;;  %v3714_v54 = vmul.f32 %v4552_v50, %v3698_v46 }
 0x223   : > { %v3712_v55 = vmul.f32 %v4554_v51, %v3697_v49 }
 0x224   : > { %v3716_v56 = vsel %vm279_vm0, %v3714_v54, 0.0 }
 0x225   : > { %v3715_v57 = vsel %vm279_vm0, %v3712_v55, 0.0 }
 0x226   : > { %v3717_v58 = vadd.f32 %v3716_v56, %v3715_v57  ;;  %s4516_s14 = spop %4515 }
 0x228   : > { %3718 = vadd.xlane.f32.xlu1 %v3717_v58 }
 0x279   : > { %v1127_v1 = vpop.xlane.xlu0 %1126 }
 0x27a   : > { %v1128_v2 = vrot.slane %v1127_v1, 4 }
 0x27c   : > { %v1129_v9 = vadd.f32 %v1128_v2, %v1127_v1 }
 0x27d   : > { %v2882_v11 = vpop.xlane.xlu0 %2881 }
 0x27e   : > { %v1130_v14 = vrot.slane %v1129_v9, 2  ;;  %v2883_v13 = vrot.slane %v2882_v11, 4 }
 0x280   : > { %v1131_v19 = vadd.f32 %v1130_v14, %v1129_v9  ;;  %v2884_v52 = vadd.f32 %v2883_v13, %v2882_v11 }
 0x282   : > { %v1132_v7 = vrot.slane %v1131_v19, 1  ;;  %v2885_v48 = vrot.slane %v2884_v52, 2 }
 0x284   : > { %v1133_v21 = vadd.f32 %v1132_v7, %v1131_v19  ;;  %v2886_v18 = vadd.f32 %v2885_v48, %v2884_v52 }
 0x286   : > { %4517 = vpush %v1133_v21  ;;  %v2887_v36 = vrot.slane %v2886_v18, 1 }
 0x287   : > { %4519 = vpush %v1160_v20 }
 0x288   : > { %v2888_v39 = vadd.f32 %v2887_v36, %v2886_v18 }
 0x28d   : > { %v1991_v24 = vpop.xlane.xlu1 %1990 }
 0x28e   : > { %v1992_v3 = vrot.slane %v1991_v24, 4 }
 0x290   : > { %v1993_v26 = vadd.f32 %v1992_v3, %v1991_v24 }
 0x292   : > { %v1994_v27 = vrot.slane %v1993_v26, 2 }
 0x294   : > { %v1995_v10 = vadd.f32 %v1994_v27, %v1993_v26 }
 0x296   : > { %v1996_v12 = vrot.slane %v1995_v10, 1 }
 0x298   : > { %v1997_v47 = vadd.f32 %v1996_v12, %v1995_v10 }
 0x29a   : > { %4521 = vpush %v1997_v47 }
 0x29b   : > { %4523 = vpush %v2024_v31 }
 0x2a1   : > { %v2855_v53 = vpop.xlane.xlu1 %2854 }
 0x2a2   : > { %v2856_v0 = vrot.slane %v2855_v53, 4 }
 0x2a4   : > { %v2857_v32 = vadd.f32 %v2856_v0, %v2855_v53 }
 0x2a6   : > { %v2858_v35 = vrot.slane %v2857_v32, 2 }
 0x2a8   : > { %v2859_v37 = vadd.f32 %v2858_v35, %v2857_v32 }
 0x2aa   : > { %v2860_v38 = vrot.slane %v2859_v37, 1 }
 0x2ac   : > { %v2861_v40 = vadd.f32 %v2860_v38, %v2859_v37 }
 0x2ae   : > { %4525 = vpush %v2861_v40 }
 0x2af   : > { %4527 = vpush %v2888_v39 }
 0x2b5   : > { %v3719_v28 = vpop.xlane.xlu1 %3718 }
 0x2b6   : > { %v3720_v33 = vrot.slane %v3719_v28, 4 }
 0x2b7   : > { %s4518_s15 = spop %4517 }
 0x2b8   : > { %v3721_v41 = vadd.f32 %v3720_v33, %v3719_v28  ;;  %s4520_s16 = spop %4519 }
 0x2b9   : > { %s1162_s17 = sadd.f32 %s4520_s16, %s4516_s14 }
 0x2ba   : > { %v3722_v29 = vrot.slane %v3721_v41, 2 }
 0x2bc   : > { %v3723_v34 = vadd.f32 %v3722_v29, %v3721_v41 }
 0x2be   : > { %v3724_v4 = vrot.slane %v3723_v34, 1 }
 0x2c0   : > { %v3725_v5 = vadd.f32 %v3724_v4, %v3723_v34 }
 0x2c2   : > { %4529 = vpush %v3725_v5 }
 0x2cb   : > { %s4522_s20 = spop %4521 }
 0x2cc   : > { %s4524_s21 = spop %4523  ;;  %s1999_s25 = sadd.f32 %s4522_s20, %s4518_s15 }
 0x2cd   : > { %s2026_s22 = sadd.f32 %s4524_s21, %s1162_s17 }
 0x2df   : > { %s4526_s23 = spop %4525 }
 0x2e0   : > { %s4528_s24 = spop %4527  ;;  %s2863_s27 = sadd.f32 %s4526_s23, %s1999_s25 }
 0x2e1   : > { %s2890_s26 = sadd.f32 %s4528_s24, %s2026_s22 }
 0x2e3   : > { %s3728_s30 = smul.f32 0.0009765625, %s2890_s26 }
 0x2e5   : > { %s3731_s8 = smul.f32 0.15, %s3728_s30 }
 0x2f3   : > { %s4530_s28 = spop %4529 }
 0x2f4   : > { %s3727_s29 = sadd.f32 %s4530_s28, %s2863_s27 }
 0x2f6   : > { %s3729_s6 = smul.f32 0.0009765625, %s3727_s29 }
 0x2f8   : > { %s3730_s7 = ssub.f32 1.0, %s3729_s6 }
 0x2fa   : > { %s3732_s9 = smul.f32 0.85, %s3730_s7 }
 0x2fc   : > { %s3733_s13 = sadd.f32 %s3732_s9, %s3731_s8 }
 0x2fe   : > { %v3734_v15 = vstv %s3733_s13 }
 0x2ff   : > { %3735 = vst [vmem:[%s260_s12] sm:$0x1] %v3734_v15 }
 0x300 PF: > { %s15_s18 = sadd.s32 1, %s4561_s18  }
 0x301   : > { %p12_p4 = scmp.ge.s32.totalorder %s15_s18, 4  }
 0x303   :  { %14 = sbr.rel (!%p12_p4) target bundleno = 1 (0x1), region = 82 }

</bundles_post_ra>
